<compile_context>
chip_gen: v7x
topology: tpu7x:2x2x1
jax: 0.10.0
libtpu: 0.0.40
codegen_flags: <defaults>
</compile_context>

<pallas_src>
import functools

import jax
import jax.numpy as jnp
import numpy as np
from jax.experimental import pallas as pl
from jax.experimental.pallas import tpu as pltpu

# ---------------- model hyper-parameters (small, consistent with module) -----
INPUT_DIM = 8
HIDDEN_DIM = 32
MLP_DIM = 64
OUTPUT_DIM = 8
NUM_LAYERS = 2          # kernel below is specialized to 2 stacked layers
BATCH = 4
SEQ = 8

BN_EPS = 1e-5


def _round8(n):
    return (n + 7) // 8 * 8


# ------------------------------ Pallas kernel --------------------------------
def _lstm_mlp_kernel(T, B, H, D, M, O, x_ref, lstm_ref, mlp_ref, out_ref):
    # x_ref    : (T*B, D)   time-major flattened input
    # lstm_ref : (120, 4H)  packed [wih0; whh0; b0; wih1; whh1; b1] (8-row aligned)
    # mlp_ref  : (184, M)   packed [w1; b1; w2f; b2f; w3p; b3p]     (8-row aligned)
    # out_ref  : (B, O)

    # ---- unpack LSTM params (static, tile-aligned row slices of the slab) ----
    r = 0
    wih0 = lstm_ref[r:r + D, :]; r += _round8(D)
    whh0 = lstm_ref[r:r + H, :]; r += _round8(H)
    b0   = lstm_ref[r:r + 1, :]; r += 8
    wih1 = lstm_ref[r:r + H, :]; r += _round8(H)
    whh1 = lstm_ref[r:r + H, :]; r += _round8(H)
    b1   = lstm_ref[r:r + 1, :]; r += 8

    # Layer-0 input projection for ALL timesteps in one matmul, bias folded in.
    # Kept as a value (4 vregs), not VMEM scratch.
    pg0 = jnp.dot(x_ref[...], wih0, preferred_element_type=jnp.float32) + b0  # (T*B, 4H)

    h0 = jnp.zeros((B, H), jnp.float32)
    c0 = jnp.zeros((B, H), jnp.float32)
    h1 = jnp.zeros((B, H), jnp.float32)
    c1 = jnp.zeros((B, H), jnp.float32)

    def lstm_cell(gates, c):
        # PyTorch gate order i, f, g, o.  One full-width sigmoid; tanh only on
        # the g slice (no wasted full-4H tanh).
        s = jax.nn.sigmoid(gates)
        i_g = s[:, 0:H]
        f_g = s[:, H:2 * H]
        o_g = s[:, 3 * H:4 * H]
        g_g = jnp.tanh(gates[:, 2 * H:3 * H])
        c_new = f_g * c + i_g * g_g
        h_new = o_g * jnp.tanh(c_new)
        return h_new, c_new

    # ---- wavefront over the two stacked layers (fully unrolled in time) ----
    # Layer-1 step t depends only on h0_t (just produced) and (h1, c1) from t-1,
    # so the scheduler can overlap it with layer-0 step t+1.
    for t in range(T):
        g0 = pg0[t * B:(t + 1) * B, :] + jnp.dot(
            h0, whh0, preferred_element_type=jnp.float32)
        h0, c0 = lstm_cell(g0, c0)

        g1 = (jnp.dot(h0, wih1, preferred_element_type=jnp.float32)
              + jnp.dot(h1, whh1, preferred_element_type=jnp.float32) + b1)
        h1, c1 = lstm_cell(g1, c1)

    # ---- MLP head on the last hidden state of the top layer ----
    # (eval-mode BatchNorm already folded into w2f/b2f and w3p/b3p; Dropout is
    #  identity in eval mode.)
    r = 0
    w1  = mlp_ref[r:r + H, :]; r += _round8(H)
    bb1 = mlp_ref[r:r + 1, :]; r += 8
    w2  = mlp_ref[r:r + M, :]; r += _round8(M)
    bb2 = mlp_ref[r:r + 1, :]; r += 8
    w3  = mlp_ref[r:r + M, :]; r += _round8(M)
    bb3 = mlp_ref[r:r + 1, :]; r += 8

    y = jnp.maximum(jnp.dot(h1, w1, preferred_element_type=jnp.float32) + bb1, 0.0)
    y = jnp.maximum(jnp.dot(y, w2, preferred_element_type=jnp.float32) + bb2, 0.0)
    y = jnp.dot(y, w3, preferred_element_type=jnp.float32) + bb3   # (B, M), padded
    out_ref[...] = y[:, :O]


# ------------------------------ parameter packing -----------------------------
def _pad_rows(a, rows):
    r = a.shape[0]
    return jnp.pad(a, ((0, rows - r), (0, 0)))


def pack_params(lstm_params, mlp_params):
    """Fold biases / eval-mode BN and pack everything into two lane-dense slabs."""
    # --- LSTM slab: [wih; whh; (bih+bhh)] per layer, each section 8-row aligned.
    secs = []
    for (wih, whh, bih, bhh) in lstm_params:
        secs.append(_pad_rows(wih, _round8(wih.shape[0])))
        secs.append(_pad_rows(whh, _round8(whh.shape[0])))
        secs.append(_pad_rows((bih + bhh).reshape(1, -1), 8))
    lstm_slab = jnp.concatenate(secs, axis=0)                    # (120, 4H)

    # --- MLP slab with BatchNorm folded into the FOLLOWING linear layers.
    (w1, b1, g1, be1, rm1, rv1,
     w2, b2, g2, be2, rm2, rv2,
     w3, b3) = mlp_params
    a1 = g1 / jnp.sqrt(rv1 + BN_EPS); s1 = be1 - rm1 * a1        # BN1(x) = a1*x + s1
    a2 = g2 / jnp.sqrt(rv2 + BN_EPS); s2 = be2 - rm2 * a2        # BN2(x) = a2*x + s2
    w2f = w2 * a1.reshape(-1, 1)
    b2f = b2 + s1 @ w2
    w3f = w3 * a2.reshape(-1, 1)
    b3f = b3 + s2 @ w3
    # Pad the output projection to MLP_DIM lanes so all sections share one slab.
    w3p = jnp.pad(w3f, ((0, 0), (0, MLP_DIM - OUTPUT_DIM)))
    b3p = jnp.pad(b3f, ((0, 0), (0, MLP_DIM - OUTPUT_DIM)))
    secs = [_pad_rows(w1, _round8(HIDDEN_DIM)), _pad_rows(b1, 8),
            _pad_rows(w2f, _round8(MLP_DIM)),   _pad_rows(b2f, 8),
            _pad_rows(w3p, _round8(MLP_DIM)),   _pad_rows(b3p, 8)]
    mlp_slab = jnp.concatenate(secs, axis=0)                     # (184, M)
    return lstm_slab, mlp_slab


# ------------------------------ wrapper ---------------------------------------
def lstm_model_forward(x_btd, lstm_params, mlp_params):
    """x_btd: (B, T, input_dim) float32 — same layout the PyTorch module receives."""
    B, T, D = x_btd.shape
    # Time-major flat slab so layer-0's input projection for all timesteps is a
    # single matmul and the per-step rows are t*B:(t+1)*B.
    x_flat = jnp.transpose(x_btd, (1, 0, 2)).reshape(T * B, D)
    lstm_slab, mlp_slab = pack_params(lstm_params, mlp_params)

    kernel = functools.partial(_lstm_mlp_kernel, T, B, HIDDEN_DIM, D,
                               MLP_DIM, OUTPUT_DIM)

    out = pl.pallas_call(
        kernel,
        out_shape=jax.ShapeDtypeStruct((B, OUTPUT_DIM), jnp.float32),
        in_specs=[pl.BlockSpec(memory_space=pltpu.MemorySpace.VMEM)] * 3,
        out_specs=pl.BlockSpec(memory_space=pltpu.MemorySpace.VMEM),
    )(x_flat, lstm_slab, mlp_slab)
    return out


# ------------------------------ parameter init --------------------------------
def init_params(key):
    keys = iter(jax.random.split(key, 64))

    def u(shape, scale):
        return jax.random.uniform(next(keys), shape, jnp.float32, -scale, scale)

    lstm_params = []
    k_h = 1.0 / np.sqrt(HIDDEN_DIM)
    for l in range(NUM_LAYERS):
        in_dim = INPUT_DIM if l == 0 else HIDDEN_DIM
        wih = u((in_dim, 4 * HIDDEN_DIM), k_h)          # pre-transposed (in, 4H)
        whh = u((HIDDEN_DIM, 4 * HIDDEN_DIM), k_h)      # pre-transposed (H, 4H)
        bih = u((1, 4 * HIDDEN_DIM), k_h)
        bhh = u((1, 4 * HIDDEN_DIM), k_h)
        lstm_params.append((wih, whh, bih, bhh))

    def linear(in_f, out_f):
        k = 1.0 / np.sqrt(in_f)
        return u((in_f, out_f), k), u((1, out_f), k)

    w1, b1 = linear(HIDDEN_DIM, MLP_DIM)
    w2, b2 = linear(MLP_DIM, MLP_DIM)
    w3, b3 = linear(MLP_DIM, OUTPUT_DIM)
    # BatchNorm1d defaults: gamma=1, beta=0, running_mean=0, running_var=1
    ones = jnp.ones((1, MLP_DIM), jnp.float32)
    zeros = jnp.zeros((1, MLP_DIM), jnp.float32)
    mlp_params = (w1, b1, ones, zeros, zeros, ones,
                  w2, b2, ones, zeros, zeros, ones,
                  w3, b3)
    return lstm_params, mlp_params


# ------------------------------ pure-JAX reference ----------------------------
def reference_forward(x, lstm_params, mlp_params):
    B, T, _ = x.shape
    h_in = x
    for (wih, whh, bih, bhh) in lstm_params:
        h = jnp.zeros((B, HIDDEN_DIM), jnp.float32)
        c = jnp.zeros((B, HIDDEN_DIM), jnp.float32)
        outs = []
        for t in range(T):
            g = h_in[:, t, :] @ wih + h @ whh + bih + bhh
            Hh = HIDDEN_DIM
            i = jax.nn.sigmoid(g[:, :Hh])
            f = jax.nn.sigmoid(g[:, Hh:2 * Hh])
            gg = jnp.tanh(g[:, 2 * Hh:3 * Hh])
            o = jax.nn.sigmoid(g[:, 3 * Hh:])
            c = f * c + i * gg
            h = o * jnp.tanh(c)
            outs.append(h)
        h_in = jnp.stack(outs, axis=1)
    hl = h_in[:, -1, :]
    (w1, b1, g1, be1, rm1, rv1, w2, b2, g2, be2, rm2, rv2, w3, b3) = mlp_params
    y = jnp.maximum(hl @ w1 + b1, 0.0)
    y = (y - rm1) / jnp.sqrt(rv1 + BN_EPS) * g1 + be1
    y = jnp.maximum(y @ w2 + b2, 0.0)
    y = (y - rm2) / jnp.sqrt(rv2 + BN_EPS) * g2 + be2
    return y @ w3 + b3


# ------------------------------ main -------------------------------------------
if __name__ == "__main__":
    key = jax.random.PRNGKey(0)
    k_x, k_p = jax.random.split(key)
    x = jax.random.normal(k_x, (BATCH, SEQ, INPUT_DIM), jnp.float32)
    lstm_params, mlp_params = init_params(k_p)

    out = lstm_model_forward(x, lstm_params, mlp_params)
    out = jax.block_until_ready(out)

    ref = reference_forward(x, lstm_params, mlp_params)
    assert out.shape == (BATCH, OUTPUT_DIM)
    np.testing.assert_allclose(np.asarray(out), np.asarray(ref), rtol=1e-4, atol=1e-4)

    print("KERNEL_OK")
</pallas_src>

<mosaic_0001>
module attributes {stable_mosaic.version = 11 : i64} {
  func.func @_lstm_mlp_kernel(%arg0: memref<32x8xf32, #tpu.memory_space<vmem>>, %arg1: memref<120x128xf32, #tpu.memory_space<vmem>>, %arg2: memref<184x64xf32, #tpu.memory_space<vmem>>, %arg3: memref<4x8xf32, #tpu.memory_space<vmem>>) attributes {dimension_semantics = [], scalar_prefetch = 0 : i64, scratch_operands = 0 : i64, tpu.core_type = #tpu.core_type<tc>} {
    %c0 = arith.constant 0 : index
    %c0_0 = arith.constant 0 : index
    %0 = vector.load %arg1[%c0, %c0_0] : memref<120x128xf32, #tpu.memory_space<vmem>>, vector<8x128xf32>
    %c8 = arith.constant 8 : index
    %c0_1 = arith.constant 0 : index
    %1 = vector.load %arg1[%c8, %c0_1] : memref<120x128xf32, #tpu.memory_space<vmem>>, vector<32x128xf32>
    %c40 = arith.constant 40 : index
    %c0_2 = arith.constant 0 : index
    %2 = vector.load %arg1[%c40, %c0_2] : memref<120x128xf32, #tpu.memory_space<vmem>>, vector<1x128xf32>
    %c48 = arith.constant 48 : index
    %c0_3 = arith.constant 0 : index
    %3 = vector.load %arg1[%c48, %c0_3] : memref<120x128xf32, #tpu.memory_space<vmem>>, vector<32x128xf32>
    %c80 = arith.constant 80 : index
    %c0_4 = arith.constant 0 : index
    %4 = vector.load %arg1[%c80, %c0_4] : memref<120x128xf32, #tpu.memory_space<vmem>>, vector<32x128xf32>
    %c112 = arith.constant 112 : index
    %c0_5 = arith.constant 0 : index
    %5 = vector.load %arg1[%c112, %c0_5] : memref<120x128xf32, #tpu.memory_space<vmem>>, vector<1x128xf32>
    %c0_6 = arith.constant 0 : index
    %c0_7 = arith.constant 0 : index
    %6 = vector.load %arg0[%c0_6, %c0_7] : memref<32x8xf32, #tpu.memory_space<vmem>>, vector<32x8xf32>
    %cst = arith.constant dense<0.000000e+00> : vector<32x128xf32>
    %7 = tpu.matmul %6, %0, %cst {dimension_numbers = #tpu.dot_dimension_numbers<[1], [0], [0], [1], [0, 0, 1, 1], [], []>} : vector<32x8xf32>, vector<8x128xf32>, vector<32x128xf32> -> vector<32x128xf32>
    %8 = vector.broadcast %2 : vector<1x128xf32> to vector<32x128xf32>
    %9 = arith.addf %7, %8 : vector<32x128xf32>
    %cst_8 = arith.constant 0.000000e+00 : f32
    %10 = vector.broadcast %cst_8 : f32 to vector<4x32xf32>
    %cst_9 = arith.constant 0.000000e+00 : f32
    %11 = vector.broadcast %cst_9 : f32 to vector<4x32xf32>
    %cst_10 = arith.constant 0.000000e+00 : f32
    %12 = vector.broadcast %cst_10 : f32 to vector<4x32xf32>
    %cst_11 = arith.constant 0.000000e+00 : f32
    %13 = vector.broadcast %cst_11 : f32 to vector<4x32xf32>
    %14 = vector.extract_strided_slice %9 {offsets = [0, 0], sizes = [4, 128], strides = [1, 1]} : vector<32x128xf32> to vector<4x128xf32>
    %cst_12 = arith.constant dense<0.000000e+00> : vector<4x128xf32>
    %15 = tpu.matmul %10, %1, %cst_12 {dimension_numbers = #tpu.dot_dimension_numbers<[1], [0], [0], [1], [0, 0, 1, 1], [], []>} : vector<4x32xf32>, vector<32x128xf32>, vector<4x128xf32> -> vector<4x128xf32>
    %16 = arith.addf %14, %15 : vector<4x128xf32>
    %17 = arith.negf %16 : vector<4x128xf32>
    %18 = math.exp %17 : vector<4x128xf32>
    %cst_13 = arith.constant 1.000000e+00 : f32
    %19 = vector.broadcast %cst_13 : f32 to vector<4x128xf32>
    %20 = arith.addf %19, %18 : vector<4x128xf32>
    %21 = arith.divf %19, %20 : vector<4x128xf32>
    %22 = vector.extract_strided_slice %21 {offsets = [0, 0], sizes = [4, 32], strides = [1, 1]} : vector<4x128xf32> to vector<4x32xf32>
    %23 = vector.extract_strided_slice %21 {offsets = [0, 32], sizes = [4, 32], strides = [1, 1]} : vector<4x128xf32> to vector<4x32xf32>
    %24 = vector.extract_strided_slice %21 {offsets = [0, 96], sizes = [4, 32], strides = [1, 1]} : vector<4x128xf32> to vector<4x32xf32>
    %25 = vector.extract_strided_slice %16 {offsets = [0, 64], sizes = [4, 32], strides = [1, 1]} : vector<4x128xf32> to vector<4x32xf32>
    %26 = math.tanh %25 : vector<4x32xf32>
    %27 = arith.mulf %23, %11 : vector<4x32xf32>
    %28 = arith.mulf %22, %26 : vector<4x32xf32>
    %29 = arith.addf %27, %28 : vector<4x32xf32>
    %30 = math.tanh %29 : vector<4x32xf32>
    %31 = arith.mulf %24, %30 : vector<4x32xf32>
    %cst_14 = arith.constant dense<0.000000e+00> : vector<4x128xf32>
    %32 = tpu.matmul %31, %3, %cst_14 {dimension_numbers = #tpu.dot_dimension_numbers<[1], [0], [0], [1], [0, 0, 1, 1], [], []>} : vector<4x32xf32>, vector<32x128xf32>, vector<4x128xf32> -> vector<4x128xf32>
    %cst_15 = arith.constant dense<0.000000e+00> : vector<4x128xf32>
    %33 = tpu.matmul %12, %4, %cst_15 {dimension_numbers = #tpu.dot_dimension_numbers<[1], [0], [0], [1], [0, 0, 1, 1], [], []>} : vector<4x32xf32>, vector<32x128xf32>, vector<4x128xf32> -> vector<4x128xf32>
    %34 = arith.addf %32, %33 : vector<4x128xf32>
    %35 = vector.broadcast %5 : vector<1x128xf32> to vector<4x128xf32>
    %36 = arith.addf %34, %35 : vector<4x128xf32>
    %37 = arith.negf %36 : vector<4x128xf32>
    %38 = math.exp %37 : vector<4x128xf32>
    %cst_16 = arith.constant 1.000000e+00 : f32
    %39 = vector.broadcast %cst_16 : f32 to vector<4x128xf32>
    %40 = arith.addf %39, %38 : vector<4x128xf32>
    %41 = arith.divf %39, %40 : vector<4x128xf32>
    %42 = vector.extract_strided_slice %41 {offsets = [0, 0], sizes = [4, 32], strides = [1, 1]} : vector<4x128xf32> to vector<4x32xf32>
    %43 = vector.extract_strided_slice %41 {offsets = [0, 32], sizes = [4, 32], strides = [1, 1]} : vector<4x128xf32> to vector<4x32xf32>
    %44 = vector.extract_strided_slice %41 {offsets = [0, 96], sizes = [4, 32], strides = [1, 1]} : vector<4x128xf32> to vector<4x32xf32>
    %45 = vector.extract_strided_slice %36 {offsets = [0, 64], sizes = [4, 32], strides = [1, 1]} : vector<4x128xf32> to vector<4x32xf32>
    %46 = math.tanh %45 : vector<4x32xf32>
    %47 = arith.mulf %43, %13 : vector<4x32xf32>
    %48 = arith.mulf %42, %46 : vector<4x32xf32>
    %49 = arith.addf %47, %48 : vector<4x32xf32>
    %50 = math.tanh %49 : vector<4x32xf32>
    %51 = arith.mulf %44, %50 : vector<4x32xf32>
    %52 = vector.extract_strided_slice %9 {offsets = [4, 0], sizes = [4, 128], strides = [1, 1]} : vector<32x128xf32> to vector<4x128xf32>
    %cst_17 = arith.constant dense<0.000000e+00> : vector<4x128xf32>
    %53 = tpu.matmul %31, %1, %cst_17 {dimension_numbers = #tpu.dot_dimension_numbers<[1], [0], [0], [1], [0, 0, 1, 1], [], []>} : vector<4x32xf32>, vector<32x128xf32>, vector<4x128xf32> -> vector<4x128xf32>
    %54 = arith.addf %52, %53 : vector<4x128xf32>
    %55 = arith.negf %54 : vector<4x128xf32>
    %56 = math.exp %55 : vector<4x128xf32>
    %cst_18 = arith.constant 1.000000e+00 : f32
    %57 = vector.broadcast %cst_18 : f32 to vector<4x128xf32>
    %58 = arith.addf %57, %56 : vector<4x128xf32>
    %59 = arith.divf %57, %58 : vector<4x128xf32>
    %60 = vector.extract_strided_slice %59 {offsets = [0, 0], sizes = [4, 32], strides = [1, 1]} : vector<4x128xf32> to vector<4x32xf32>
    %61 = vector.extract_strided_slice %59 {offsets = [0, 32], sizes = [4, 32], strides = [1, 1]} : vector<4x128xf32> to vector<4x32xf32>
    %62 = vector.extract_strided_slice %59 {offsets = [0, 96], sizes = [4, 32], strides = [1, 1]} : vector<4x128xf32> to vector<4x32xf32>
    %63 = vector.extract_strided_slice %54 {offsets = [0, 64], sizes = [4, 32], strides = [1, 1]} : vector<4x128xf32> to vector<4x32xf32>
    %64 = math.tanh %63 : vector<4x32xf32>
    %65 = arith.mulf %61, %29 : vector<4x32xf32>
    %66 = arith.mulf %60, %64 : vector<4x32xf32>
    %67 = arith.addf %65, %66 : vector<4x32xf32>
    %68 = math.tanh %67 : vector<4x32xf32>
    %69 = arith.mulf %62, %68 : vector<4x32xf32>
    %cst_19 = arith.constant dense<0.000000e+00> : vector<4x128xf32>
    %70 = tpu.matmul %69, %3, %cst_19 {dimension_numbers = #tpu.dot_dimension_numbers<[1], [0], [0], [1], [0, 0, 1, 1], [], []>} : vector<4x32xf32>, vector<32x128xf32>, vector<4x128xf32> -> vector<4x128xf32>
    %cst_20 = arith.constant dense<0.000000e+00> : vector<4x128xf32>
    %71 = tpu.matmul %51, %4, %cst_20 {dimension_numbers = #tpu.dot_dimension_numbers<[1], [0], [0], [1], [0, 0, 1, 1], [], []>} : vector<4x32xf32>, vector<32x128xf32>, vector<4x128xf32> -> vector<4x128xf32>
    %72 = arith.addf %70, %71 : vector<4x128xf32>
    %73 = vector.broadcast %5 : vector<1x128xf32> to vector<4x128xf32>
    %74 = arith.addf %72, %73 : vector<4x128xf32>
    %75 = arith.negf %74 : vector<4x128xf32>
    %76 = math.exp %75 : vector<4x128xf32>
    %cst_21 = arith.constant 1.000000e+00 : f32
    %77 = vector.broadcast %cst_21 : f32 to vector<4x128xf32>
    %78 = arith.addf %77, %76 : vector<4x128xf32>
    %79 = arith.divf %77, %78 : vector<4x128xf32>
    %80 = vector.extract_strided_slice %79 {offsets = [0, 0], sizes = [4, 32], strides = [1, 1]} : vector<4x128xf32> to vector<4x32xf32>
    %81 = vector.extract_strided_slice %79 {offsets = [0, 32], sizes = [4, 32], strides = [1, 1]} : vector<4x128xf32> to vector<4x32xf32>
    %82 = vector.extract_strided_slice %79 {offsets = [0, 96], sizes = [4, 32], strides = [1, 1]} : vector<4x128xf32> to vector<4x32xf32>
    %83 = vector.extract_strided_slice %74 {offsets = [0, 64], sizes = [4, 32], strides = [1, 1]} : vector<4x128xf32> to vector<4x32xf32>
    %84 = math.tanh %83 : vector<4x32xf32>
    %85 = arith.mulf %81, %49 : vector<4x32xf32>
    %86 = arith.mulf %80, %84 : vector<4x32xf32>
    %87 = arith.addf %85, %86 : vector<4x32xf32>
    %88 = math.tanh %87 : vector<4x32xf32>
    %89 = arith.mulf %82, %88 : vector<4x32xf32>
    %90 = vector.extract_strided_slice %9 {offsets = [8, 0], sizes = [4, 128], strides = [1, 1]} : vector<32x128xf32> to vector<4x128xf32>
    %cst_22 = arith.constant dense<0.000000e+00> : vector<4x128xf32>
    %91 = tpu.matmul %69, %1, %cst_22 {dimension_numbers = #tpu.dot_dimension_numbers<[1], [0], [0], [1], [0, 0, 1, 1], [], []>} : vector<4x32xf32>, vector<32x128xf32>, vector<4x128xf32> -> vector<4x128xf32>
    %92 = arith.addf %90, %91 : vector<4x128xf32>
    %93 = arith.negf %92 : vector<4x128xf32>
    %94 = math.exp %93 : vector<4x128xf32>
    %cst_23 = arith.constant 1.000000e+00 : f32
    %95 = vector.broadcast %cst_23 : f32 to vector<4x128xf32>
    %96 = arith.addf %95, %94 : vector<4x128xf32>
    %97 = arith.divf %95, %96 : vector<4x128xf32>
    %98 = vector.extract_strided_slice %97 {offsets = [0, 0], sizes = [4, 32], strides = [1, 1]} : vector<4x128xf32> to vector<4x32xf32>
    %99 = vector.extract_strided_slice %97 {offsets = [0, 32], sizes = [4, 32], strides = [1, 1]} : vector<4x128xf32> to vector<4x32xf32>
    %100 = vector.extract_strided_slice %97 {offsets = [0, 96], sizes = [4, 32], strides = [1, 1]} : vector<4x128xf32> to vector<4x32xf32>
    %101 = vector.extract_strided_slice %92 {offsets = [0, 64], sizes = [4, 32], strides = [1, 1]} : vector<4x128xf32> to vector<4x32xf32>
    %102 = math.tanh %101 : vector<4x32xf32>
    %103 = arith.mulf %99, %67 : vector<4x32xf32>
    %104 = arith.mulf %98, %102 : vector<4x32xf32>
    %105 = arith.addf %103, %104 : vector<4x32xf32>
    %106 = math.tanh %105 : vector<4x32xf32>
    %107 = arith.mulf %100, %106 : vector<4x32xf32>
    %cst_24 = arith.constant dense<0.000000e+00> : vector<4x128xf32>
    %108 = tpu.matmul %107, %3, %cst_24 {dimension_numbers = #tpu.dot_dimension_numbers<[1], [0], [0], [1], [0, 0, 1, 1], [], []>} : vector<4x32xf32>, vector<32x128xf32>, vector<4x128xf32> -> vector<4x128xf32>
    %cst_25 = arith.constant dense<0.000000e+00> : vector<4x128xf32>
    %109 = tpu.matmul %89, %4, %cst_25 {dimension_numbers = #tpu.dot_dimension_numbers<[1], [0], [0], [1], [0, 0, 1, 1], [], []>} : vector<4x32xf32>, vector<32x128xf32>, vector<4x128xf32> -> vector<4x128xf32>
    %110 = arith.addf %108, %109 : vector<4x128xf32>
    %111 = vector.broadcast %5 : vector<1x128xf32> to vector<4x128xf32>
    %112 = arith.addf %110, %111 : vector<4x128xf32>
    %113 = arith.negf %112 : vector<4x128xf32>
    %114 = math.exp %113 : vector<4x128xf32>
    %cst_26 = arith.constant 1.000000e+00 : f32
    %115 = vector.broadcast %cst_26 : f32 to vector<4x128xf32>
    %116 = arith.addf %115, %114 : vector<4x128xf32>
    %117 = arith.divf %115, %116 : vector<4x128xf32>
    %118 = vector.extract_strided_slice %117 {offsets = [0, 0], sizes = [4, 32], strides = [1, 1]} : vector<4x128xf32> to vector<4x32xf32>
    %119 = vector.extract_strided_slice %117 {offsets = [0, 32], sizes = [4, 32], strides = [1, 1]} : vector<4x128xf32> to vector<4x32xf32>
    %120 = vector.extract_strided_slice %117 {offsets = [0, 96], sizes = [4, 32], strides = [1, 1]} : vector<4x128xf32> to vector<4x32xf32>
    %121 = vector.extract_strided_slice %112 {offsets = [0, 64], sizes = [4, 32], strides = [1, 1]} : vector<4x128xf32> to vector<4x32xf32>
    %122 = math.tanh %121 : vector<4x32xf32>
    %123 = arith.mulf %119, %87 : vector<4x32xf32>
    %124 = arith.mulf %118, %122 : vector<4x32xf32>
    %125 = arith.addf %123, %124 : vector<4x32xf32>
    %126 = math.tanh %125 : vector<4x32xf32>
    %127 = arith.mulf %120, %126 : vector<4x32xf32>
    %128 = vector.extract_strided_slice %9 {offsets = [12, 0], sizes = [4, 128], strides = [1, 1]} : vector<32x128xf32> to vector<4x128xf32>
    %cst_27 = arith.constant dense<0.000000e+00> : vector<4x128xf32>
    %129 = tpu.matmul %107, %1, %cst_27 {dimension_numbers = #tpu.dot_dimension_numbers<[1], [0], [0], [1], [0, 0, 1, 1], [], []>} : vector<4x32xf32>, vector<32x128xf32>, vector<4x128xf32> -> vector<4x128xf32>
    %130 = arith.addf %128, %129 : vector<4x128xf32>
    %131 = arith.negf %130 : vector<4x128xf32>
    %132 = math.exp %131 : vector<4x128xf32>
    %cst_28 = arith.constant 1.000000e+00 : f32
    %133 = vector.broadcast %cst_28 : f32 to vector<4x128xf32>
    %134 = arith.addf %133, %132 : vector<4x128xf32>
    %135 = arith.divf %133, %134 : vector<4x128xf32>
    %136 = vector.extract_strided_slice %135 {offsets = [0, 0], sizes = [4, 32], strides = [1, 1]} : vector<4x128xf32> to vector<4x32xf32>
    %137 = vector.extract_strided_slice %135 {offsets = [0, 32], sizes = [4, 32], strides = [1, 1]} : vector<4x128xf32> to vector<4x32xf32>
    %138 = vector.extract_strided_slice %135 {offsets = [0, 96], sizes = [4, 32], strides = [1, 1]} : vector<4x128xf32> to vector<4x32xf32>
    %139 = vector.extract_strided_slice %130 {offsets = [0, 64], sizes = [4, 32], strides = [1, 1]} : vector<4x128xf32> to vector<4x32xf32>
    %140 = math.tanh %139 : vector<4x32xf32>
    %141 = arith.mulf %137, %105 : vector<4x32xf32>
    %142 = arith.mulf %136, %140 : vector<4x32xf32>
    %143 = arith.addf %141, %142 : vector<4x32xf32>
    %144 = math.tanh %143 : vector<4x32xf32>
    %145 = arith.mulf %138, %144 : vector<4x32xf32>
    %cst_29 = arith.constant dense<0.000000e+00> : vector<4x128xf32>
    %146 = tpu.matmul %145, %3, %cst_29 {dimension_numbers = #tpu.dot_dimension_numbers<[1], [0], [0], [1], [0, 0, 1, 1], [], []>} : vector<4x32xf32>, vector<32x128xf32>, vector<4x128xf32> -> vector<4x128xf32>
    %cst_30 = arith.constant dense<0.000000e+00> : vector<4x128xf32>
    %147 = tpu.matmul %127, %4, %cst_30 {dimension_numbers = #tpu.dot_dimension_numbers<[1], [0], [0], [1], [0, 0, 1, 1], [], []>} : vector<4x32xf32>, vector<32x128xf32>, vector<4x128xf32> -> vector<4x128xf32>
    %148 = arith.addf %146, %147 : vector<4x128xf32>
    %149 = vector.broadcast %5 : vector<1x128xf32> to vector<4x128xf32>
    %150 = arith.addf %148, %149 : vector<4x128xf32>
    %151 = arith.negf %150 : vector<4x128xf32>
    %152 = math.exp %151 : vector<4x128xf32>
    %cst_31 = arith.constant 1.000000e+00 : f32
    %153 = vector.broadcast %cst_31 : f32 to vector<4x128xf32>
    %154 = arith.addf %153, %152 : vector<4x128xf32>
    %155 = arith.divf %153, %154 : vector<4x128xf32>
    %156 = vector.extract_strided_slice %155 {offsets = [0, 0], sizes = [4, 32], strides = [1, 1]} : vector<4x128xf32> to vector<4x32xf32>
    %157 = vector.extract_strided_slice %155 {offsets = [0, 32], sizes = [4, 32], strides = [1, 1]} : vector<4x128xf32> to vector<4x32xf32>
    %158 = vector.extract_strided_slice %155 {offsets = [0, 96], sizes = [4, 32], strides = [1, 1]} : vector<4x128xf32> to vector<4x32xf32>
    %159 = vector.extract_strided_slice %150 {offsets = [0, 64], sizes = [4, 32], strides = [1, 1]} : vector<4x128xf32> to vector<4x32xf32>
    %160 = math.tanh %159 : vector<4x32xf32>
    %161 = arith.mulf %157, %125 : vector<4x32xf32>
    %162 = arith.mulf %156, %160 : vector<4x32xf32>
    %163 = arith.addf %161, %162 : vector<4x32xf32>
    %164 = math.tanh %163 : vector<4x32xf32>
    %165 = arith.mulf %158, %164 : vector<4x32xf32>
    %166 = vector.extract_strided_slice %9 {offsets = [16, 0], sizes = [4, 128], strides = [1, 1]} : vector<32x128xf32> to vector<4x128xf32>
    %cst_32 = arith.constant dense<0.000000e+00> : vector<4x128xf32>
    %167 = tpu.matmul %145, %1, %cst_32 {dimension_numbers = #tpu.dot_dimension_numbers<[1], [0], [0], [1], [0, 0, 1, 1], [], []>} : vector<4x32xf32>, vector<32x128xf32>, vector<4x128xf32> -> vector<4x128xf32>
    %168 = arith.addf %166, %167 : vector<4x128xf32>
    %169 = arith.negf %168 : vector<4x128xf32>
    %170 = math.exp %169 : vector<4x128xf32>
    %cst_33 = arith.constant 1.000000e+00 : f32
    %171 = vector.broadcast %cst_33 : f32 to vector<4x128xf32>
    %172 = arith.addf %171, %170 : vector<4x128xf32>
    %173 = arith.divf %171, %172 : vector<4x128xf32>
    %174 = vector.extract_strided_slice %173 {offsets = [0, 0], sizes = [4, 32], strides = [1, 1]} : vector<4x128xf32> to vector<4x32xf32>
    %175 = vector.extract_strided_slice %173 {offsets = [0, 32], sizes = [4, 32], strides = [1, 1]} : vector<4x128xf32> to vector<4x32xf32>
    %176 = vector.extract_strided_slice %173 {offsets = [0, 96], sizes = [4, 32], strides = [1, 1]} : vector<4x128xf32> to vector<4x32xf32>
    %177 = vector.extract_strided_slice %168 {offsets = [0, 64], sizes = [4, 32], strides = [1, 1]} : vector<4x128xf32> to vector<4x32xf32>
    %178 = math.tanh %177 : vector<4x32xf32>
    %179 = arith.mulf %175, %143 : vector<4x32xf32>
    %180 = arith.mulf %174, %178 : vector<4x32xf32>
    %181 = arith.addf %179, %180 : vector<4x32xf32>
    %182 = math.tanh %181 : vector<4x32xf32>
    %183 = arith.mulf %176, %182 : vector<4x32xf32>
    %cst_34 = arith.constant dense<0.000000e+00> : vector<4x128xf32>
    %184 = tpu.matmul %183, %3, %cst_34 {dimension_numbers = #tpu.dot_dimension_numbers<[1], [0], [0], [1], [0, 0, 1, 1], [], []>} : vector<4x32xf32>, vector<32x128xf32>, vector<4x128xf32> -> vector<4x128xf32>
    %cst_35 = arith.constant dense<0.000000e+00> : vector<4x128xf32>
    %185 = tpu.matmul %165, %4, %cst_35 {dimension_numbers = #tpu.dot_dimension_numbers<[1], [0], [0], [1], [0, 0, 1, 1], [], []>} : vector<4x32xf32>, vector<32x128xf32>, vector<4x128xf32> -> vector<4x128xf32>
    %186 = arith.addf %184, %185 : vector<4x128xf32>
    %187 = vector.broadcast %5 : vector<1x128xf32> to vector<4x128xf32>
    %188 = arith.addf %186, %187 : vector<4x128xf32>
    %189 = arith.negf %188 : vector<4x128xf32>
    %190 = math.exp %189 : vector<4x128xf32>
    %cst_36 = arith.constant 1.000000e+00 : f32
    %191 = vector.broadcast %cst_36 : f32 to vector<4x128xf32>
    %192 = arith.addf %191, %190 : vector<4x128xf32>
    %193 = arith.divf %191, %192 : vector<4x128xf32>
    %194 = vector.extract_strided_slice %193 {offsets = [0, 0], sizes = [4, 32], strides = [1, 1]} : vector<4x128xf32> to vector<4x32xf32>
    %195 = vector.extract_strided_slice %193 {offsets = [0, 32], sizes = [4, 32], strides = [1, 1]} : vector<4x128xf32> to vector<4x32xf32>
    %196 = vector.extract_strided_slice %193 {offsets = [0, 96], sizes = [4, 32], strides = [1, 1]} : vector<4x128xf32> to vector<4x32xf32>
    %197 = vector.extract_strided_slice %188 {offsets = [0, 64], sizes = [4, 32], strides = [1, 1]} : vector<4x128xf32> to vector<4x32xf32>
    %198 = math.tanh %197 : vector<4x32xf32>
    %199 = arith.mulf %195, %163 : vector<4x32xf32>
    %200 = arith.mulf %194, %198 : vector<4x32xf32>
    %201 = arith.addf %199, %200 : vector<4x32xf32>
    %202 = math.tanh %201 : vector<4x32xf32>
    %203 = arith.mulf %196, %202 : vector<4x32xf32>
    %204 = vector.extract_strided_slice %9 {offsets = [20, 0], sizes = [4, 128], strides = [1, 1]} : vector<32x128xf32> to vector<4x128xf32>
    %cst_37 = arith.constant dense<0.000000e+00> : vector<4x128xf32>
    %205 = tpu.matmul %183, %1, %cst_37 {dimension_numbers = #tpu.dot_dimension_numbers<[1], [0], [0], [1], [0, 0, 1, 1], [], []>} : vector<4x32xf32>, vector<32x128xf32>, vector<4x128xf32> -> vector<4x128xf32>
    %206 = arith.addf %204, %205 : vector<4x128xf32>
    %207 = arith.negf %206 : vector<4x128xf32>
    %208 = math.exp %207 : vector<4x128xf32>
    %cst_38 = arith.constant 1.000000e+00 : f32
    %209 = vector.broadcast %cst_38 : f32 to vector<4x128xf32>
    %210 = arith.addf %209, %208 : vector<4x128xf32>
    %211 = arith.divf %209, %210 : vector<4x128xf32>
    %212 = vector.extract_strided_slice %211 {offsets = [0, 0], sizes = [4, 32], strides = [1, 1]} : vector<4x128xf32> to vector<4x32xf32>
    %213 = vector.extract_strided_slice %211 {offsets = [0, 32], sizes = [4, 32], strides = [1, 1]} : vector<4x128xf32> to vector<4x32xf32>
    %214 = vector.extract_strided_slice %211 {offsets = [0, 96], sizes = [4, 32], strides = [1, 1]} : vector<4x128xf32> to vector<4x32xf32>
    %215 = vector.extract_strided_slice %206 {offsets = [0, 64], sizes = [4, 32], strides = [1, 1]} : vector<4x128xf32> to vector<4x32xf32>
    %216 = math.tanh %215 : vector<4x32xf32>
    %217 = arith.mulf %213, %181 : vector<4x32xf32>
    %218 = arith.mulf %212, %216 : vector<4x32xf32>
    %219 = arith.addf %217, %218 : vector<4x32xf32>
    %220 = math.tanh %219 : vector<4x32xf32>
    %221 = arith.mulf %214, %220 : vector<4x32xf32>
    %cst_39 = arith.constant dense<0.000000e+00> : vector<4x128xf32>
    %222 = tpu.matmul %221, %3, %cst_39 {dimension_numbers = #tpu.dot_dimension_numbers<[1], [0], [0], [1], [0, 0, 1, 1], [], []>} : vector<4x32xf32>, vector<32x128xf32>, vector<4x128xf32> -> vector<4x128xf32>
    %cst_40 = arith.constant dense<0.000000e+00> : vector<4x128xf32>
    %223 = tpu.matmul %203, %4, %cst_40 {dimension_numbers = #tpu.dot_dimension_numbers<[1], [0], [0], [1], [0, 0, 1, 1], [], []>} : vector<4x32xf32>, vector<32x128xf32>, vector<4x128xf32> -> vector<4x128xf32>
    %224 = arith.addf %222, %223 : vector<4x128xf32>
    %225 = vector.broadcast %5 : vector<1x128xf32> to vector<4x128xf32>
    %226 = arith.addf %224, %225 : vector<4x128xf32>
    %227 = arith.negf %226 : vector<4x128xf32>
    %228 = math.exp %227 : vector<4x128xf32>
    %cst_41 = arith.constant 1.000000e+00 : f32
    %229 = vector.broadcast %cst_41 : f32 to vector<4x128xf32>
    %230 = arith.addf %229, %228 : vector<4x128xf32>
    %231 = arith.divf %229, %230 : vector<4x128xf32>
    %232 = vector.extract_strided_slice %231 {offsets = [0, 0], sizes = [4, 32], strides = [1, 1]} : vector<4x128xf32> to vector<4x32xf32>
    %233 = vector.extract_strided_slice %231 {offsets = [0, 32], sizes = [4, 32], strides = [1, 1]} : vector<4x128xf32> to vector<4x32xf32>
    %234 = vector.extract_strided_slice %231 {offsets = [0, 96], sizes = [4, 32], strides = [1, 1]} : vector<4x128xf32> to vector<4x32xf32>
    %235 = vector.extract_strided_slice %226 {offsets = [0, 64], sizes = [4, 32], strides = [1, 1]} : vector<4x128xf32> to vector<4x32xf32>
    %236 = math.tanh %235 : vector<4x32xf32>
    %237 = arith.mulf %233, %201 : vector<4x32xf32>
    %238 = arith.mulf %232, %236 : vector<4x32xf32>
    %239 = arith.addf %237, %238 : vector<4x32xf32>
    %240 = math.tanh %239 : vector<4x32xf32>
    %241 = arith.mulf %234, %240 : vector<4x32xf32>
    %242 = vector.extract_strided_slice %9 {offsets = [24, 0], sizes = [4, 128], strides = [1, 1]} : vector<32x128xf32> to vector<4x128xf32>
    %cst_42 = arith.constant dense<0.000000e+00> : vector<4x128xf32>
    %243 = tpu.matmul %221, %1, %cst_42 {dimension_numbers = #tpu.dot_dimension_numbers<[1], [0], [0], [1], [0, 0, 1, 1], [], []>} : vector<4x32xf32>, vector<32x128xf32>, vector<4x128xf32> -> vector<4x128xf32>
    %244 = arith.addf %242, %243 : vector<4x128xf32>
    %245 = arith.negf %244 : vector<4x128xf32>
    %246 = math.exp %245 : vector<4x128xf32>
    %cst_43 = arith.constant 1.000000e+00 : f32
    %247 = vector.broadcast %cst_43 : f32 to vector<4x128xf32>
    %248 = arith.addf %247, %246 : vector<4x128xf32>
    %249 = arith.divf %247, %248 : vector<4x128xf32>
    %250 = vector.extract_strided_slice %249 {offsets = [0, 0], sizes = [4, 32], strides = [1, 1]} : vector<4x128xf32> to vector<4x32xf32>
    %251 = vector.extract_strided_slice %249 {offsets = [0, 32], sizes = [4, 32], strides = [1, 1]} : vector<4x128xf32> to vector<4x32xf32>
    %252 = vector.extract_strided_slice %249 {offsets = [0, 96], sizes = [4, 32], strides = [1, 1]} : vector<4x128xf32> to vector<4x32xf32>
    %253 = vector.extract_strided_slice %244 {offsets = [0, 64], sizes = [4, 32], strides = [1, 1]} : vector<4x128xf32> to vector<4x32xf32>
    %254 = math.tanh %253 : vector<4x32xf32>
    %255 = arith.mulf %251, %219 : vector<4x32xf32>
    %256 = arith.mulf %250, %254 : vector<4x32xf32>
    %257 = arith.addf %255, %256 : vector<4x32xf32>
    %258 = math.tanh %257 : vector<4x32xf32>
    %259 = arith.mulf %252, %258 : vector<4x32xf32>
    %cst_44 = arith.constant dense<0.000000e+00> : vector<4x128xf32>
    %260 = tpu.matmul %259, %3, %cst_44 {dimension_numbers = #tpu.dot_dimension_numbers<[1], [0], [0], [1], [0, 0, 1, 1], [], []>} : vector<4x32xf32>, vector<32x128xf32>, vector<4x128xf32> -> vector<4x128xf32>
    %cst_45 = arith.constant dense<0.000000e+00> : vector<4x128xf32>
    %261 = tpu.matmul %241, %4, %cst_45 {dimension_numbers = #tpu.dot_dimension_numbers<[1], [0], [0], [1], [0, 0, 1, 1], [], []>} : vector<4x32xf32>, vector<32x128xf32>, vector<4x128xf32> -> vector<4x128xf32>
    %262 = arith.addf %260, %261 : vector<4x128xf32>
    %263 = vector.broadcast %5 : vector<1x128xf32> to vector<4x128xf32>
    %264 = arith.addf %262, %263 : vector<4x128xf32>
    %265 = arith.negf %264 : vector<4x128xf32>
    %266 = math.exp %265 : vector<4x128xf32>
    %cst_46 = arith.constant 1.000000e+00 : f32
    %267 = vector.broadcast %cst_46 : f32 to vector<4x128xf32>
    %268 = arith.addf %267, %266 : vector<4x128xf32>
    %269 = arith.divf %267, %268 : vector<4x128xf32>
    %270 = vector.extract_strided_slice %269 {offsets = [0, 0], sizes = [4, 32], strides = [1, 1]} : vector<4x128xf32> to vector<4x32xf32>
    %271 = vector.extract_strided_slice %269 {offsets = [0, 32], sizes = [4, 32], strides = [1, 1]} : vector<4x128xf32> to vector<4x32xf32>
    %272 = vector.extract_strided_slice %269 {offsets = [0, 96], sizes = [4, 32], strides = [1, 1]} : vector<4x128xf32> to vector<4x32xf32>
    %273 = vector.extract_strided_slice %264 {offsets = [0, 64], sizes = [4, 32], strides = [1, 1]} : vector<4x128xf32> to vector<4x32xf32>
    %274 = math.tanh %273 : vector<4x32xf32>
    %275 = arith.mulf %271, %239 : vector<4x32xf32>
    %276 = arith.mulf %270, %274 : vector<4x32xf32>
    %277 = arith.addf %275, %276 : vector<4x32xf32>
    %278 = math.tanh %277 : vector<4x32xf32>
    %279 = arith.mulf %272, %278 : vector<4x32xf32>
    %280 = vector.extract_strided_slice %9 {offsets = [28, 0], sizes = [4, 128], strides = [1, 1]} : vector<32x128xf32> to vector<4x128xf32>
    %cst_47 = arith.constant dense<0.000000e+00> : vector<4x128xf32>
    %281 = tpu.matmul %259, %1, %cst_47 {dimension_numbers = #tpu.dot_dimension_numbers<[1], [0], [0], [1], [0, 0, 1, 1], [], []>} : vector<4x32xf32>, vector<32x128xf32>, vector<4x128xf32> -> vector<4x128xf32>
    %282 = arith.addf %280, %281 : vector<4x128xf32>
    %283 = arith.negf %282 : vector<4x128xf32>
    %284 = math.exp %283 : vector<4x128xf32>
    %cst_48 = arith.constant 1.000000e+00 : f32
    %285 = vector.broadcast %cst_48 : f32 to vector<4x128xf32>
    %286 = arith.addf %285, %284 : vector<4x128xf32>
    %287 = arith.divf %285, %286 : vector<4x128xf32>
    %288 = vector.extract_strided_slice %287 {offsets = [0, 0], sizes = [4, 32], strides = [1, 1]} : vector<4x128xf32> to vector<4x32xf32>
    %289 = vector.extract_strided_slice %287 {offsets = [0, 32], sizes = [4, 32], strides = [1, 1]} : vector<4x128xf32> to vector<4x32xf32>
    %290 = vector.extract_strided_slice %287 {offsets = [0, 96], sizes = [4, 32], strides = [1, 1]} : vector<4x128xf32> to vector<4x32xf32>
    %291 = vector.extract_strided_slice %282 {offsets = [0, 64], sizes = [4, 32], strides = [1, 1]} : vector<4x128xf32> to vector<4x32xf32>
    %292 = math.tanh %291 : vector<4x32xf32>
    %293 = arith.mulf %289, %257 : vector<4x32xf32>
    %294 = arith.mulf %288, %292 : vector<4x32xf32>
    %295 = arith.addf %293, %294 : vector<4x32xf32>
    %296 = math.tanh %295 : vector<4x32xf32>
    %297 = arith.mulf %290, %296 : vector<4x32xf32>
    %cst_49 = arith.constant dense<0.000000e+00> : vector<4x128xf32>
    %298 = tpu.matmul %297, %3, %cst_49 {dimension_numbers = #tpu.dot_dimension_numbers<[1], [0], [0], [1], [0, 0, 1, 1], [], []>} : vector<4x32xf32>, vector<32x128xf32>, vector<4x128xf32> -> vector<4x128xf32>
    %cst_50 = arith.constant dense<0.000000e+00> : vector<4x128xf32>
    %299 = tpu.matmul %279, %4, %cst_50 {dimension_numbers = #tpu.dot_dimension_numbers<[1], [0], [0], [1], [0, 0, 1, 1], [], []>} : vector<4x32xf32>, vector<32x128xf32>, vector<4x128xf32> -> vector<4x128xf32>
    %300 = arith.addf %298, %299 : vector<4x128xf32>
    %301 = vector.broadcast %5 : vector<1x128xf32> to vector<4x128xf32>
    %302 = arith.addf %300, %301 : vector<4x128xf32>
    %303 = arith.negf %302 : vector<4x128xf32>
    %304 = math.exp %303 : vector<4x128xf32>
    %cst_51 = arith.constant 1.000000e+00 : f32
    %305 = vector.broadcast %cst_51 : f32 to vector<4x128xf32>
    %306 = arith.addf %305, %304 : vector<4x128xf32>
    %307 = arith.divf %305, %306 : vector<4x128xf32>
    %308 = vector.extract_strided_slice %307 {offsets = [0, 0], sizes = [4, 32], strides = [1, 1]} : vector<4x128xf32> to vector<4x32xf32>
    %309 = vector.extract_strided_slice %307 {offsets = [0, 32], sizes = [4, 32], strides = [1, 1]} : vector<4x128xf32> to vector<4x32xf32>
    %310 = vector.extract_strided_slice %307 {offsets = [0, 96], sizes = [4, 32], strides = [1, 1]} : vector<4x128xf32> to vector<4x32xf32>
    %311 = vector.extract_strided_slice %302 {offsets = [0, 64], sizes = [4, 32], strides = [1, 1]} : vector<4x128xf32> to vector<4x32xf32>
    %312 = math.tanh %311 : vector<4x32xf32>
    %313 = arith.mulf %309, %277 : vector<4x32xf32>
    %314 = arith.mulf %308, %312 : vector<4x32xf32>
    %315 = arith.addf %313, %314 : vector<4x32xf32>
    %316 = math.tanh %315 : vector<4x32xf32>
    %317 = arith.mulf %310, %316 : vector<4x32xf32>
    %c0_52 = arith.constant 0 : index
    %c0_53 = arith.constant 0 : index
    %318 = vector.load %arg2[%c0_52, %c0_53] : memref<184x64xf32, #tpu.memory_space<vmem>>, vector<32x64xf32>
    %c32 = arith.constant 32 : index
    %c0_54 = arith.constant 0 : index
    %319 = vector.load %arg2[%c32, %c0_54] : memref<184x64xf32, #tpu.memory_space<vmem>>, vector<1x64xf32>
    %c40_55 = arith.constant 40 : index
    %c0_56 = arith.constant 0 : index
    %320 = vector.load %arg2[%c40_55, %c0_56] : memref<184x64xf32, #tpu.memory_space<vmem>>, vector<64x64xf32>
    %c104 = arith.constant 104 : index
    %c0_57 = arith.constant 0 : index
    %321 = vector.load %arg2[%c104, %c0_57] : memref<184x64xf32, #tpu.memory_space<vmem>>, vector<1x64xf32>
    %c112_58 = arith.constant 112 : index
    %c0_59 = arith.constant 0 : index
    %322 = vector.load %arg2[%c112_58, %c0_59] : memref<184x64xf32, #tpu.memory_space<vmem>>, vector<64x64xf32>
    %c176 = arith.constant 176 : index
    %c0_60 = arith.constant 0 : index
    %323 = vector.load %arg2[%c176, %c0_60] : memref<184x64xf32, #tpu.memory_space<vmem>>, vector<1x64xf32>
    %cst_61 = arith.constant dense<0.000000e+00> : vector<4x64xf32>
    %324 = tpu.matmul %317, %318, %cst_61 {dimension_numbers = #tpu.dot_dimension_numbers<[1], [0], [0], [1], [0, 0, 1, 1], [], []>} : vector<4x32xf32>, vector<32x64xf32>, vector<4x64xf32> -> vector<4x64xf32>
    %325 = vector.broadcast %319 : vector<1x64xf32> to vector<4x64xf32>
    %326 = arith.addf %324, %325 : vector<4x64xf32>
    %cst_62 = arith.constant 0.000000e+00 : f32
    %327 = vector.broadcast %cst_62 : f32 to vector<4x64xf32>
    %328 = arith.maximumf %326, %327 : vector<4x64xf32>
    %cst_63 = arith.constant dense<0.000000e+00> : vector<4x64xf32>
    %329 = tpu.matmul %328, %320, %cst_63 {dimension_numbers = #tpu.dot_dimension_numbers<[1], [0], [0], [1], [0, 0, 1, 1], [], []>} : vector<4x64xf32>, vector<64x64xf32>, vector<4x64xf32> -> vector<4x64xf32>
    %330 = vector.broadcast %321 : vector<1x64xf32> to vector<4x64xf32>
    %331 = arith.addf %329, %330 : vector<4x64xf32>
    %cst_64 = arith.constant 0.000000e+00 : f32
    %332 = vector.broadcast %cst_64 : f32 to vector<4x64xf32>
    %333 = arith.maximumf %331, %332 : vector<4x64xf32>
    %cst_65 = arith.constant dense<0.000000e+00> : vector<4x64xf32>
    %334 = tpu.matmul %333, %322, %cst_65 {dimension_numbers = #tpu.dot_dimension_numbers<[1], [0], [0], [1], [0, 0, 1, 1], [], []>} : vector<4x64xf32>, vector<64x64xf32>, vector<4x64xf32> -> vector<4x64xf32>
    %335 = vector.broadcast %323 : vector<1x64xf32> to vector<4x64xf32>
    %336 = arith.addf %334, %335 : vector<4x64xf32>
    %337 = vector.extract_strided_slice %336 {offsets = [0, 0], sizes = [4, 8], strides = [1, 1]} : vector<4x64xf32> to vector<4x8xf32>
    %c0_66 = arith.constant 0 : index
    %c0_67 = arith.constant 0 : index
    %338 = vector.load %arg3[%c0_66, %c0_67] : memref<4x8xf32, #tpu.memory_space<vmem>>, vector<4x8xf32>
    tpu.vector_store %arg3[%c0_66, %c0_67], %337 {strides = array<i32>} : memref<4x8xf32, #tpu.memory_space<vmem>>, vector<4x8xf32>,
    return
  }
}

</mosaic_0001>

<bundles_post_ra>
// kernel: tpu_custom_call.1
= control target key start
LH: loop header
LB: loop body
LE: loop exit
PB: predicated region body
PF: predicated region fallthrough
CT: control target
= control target key end

     0   :  { %vm38_vm0 = vcmask 64512   ;;  %v3462_v3 = vmov 0.0|0.0   ;;  %s3984_s0 = inlined_call_operand.vmem [shape: f32[32,8], index: 0, kind: input, shape index: {}]   ;;  %s3985_s1 = inlined_call_operand.vmem [shape: f32[120,128], index: 1, kind: input, shape index: {}]   ;;  %s3986_s2 = inlined_call_operand.vmem [shape: f32[184,64], index: 2, kind: input, shape index: {}]   ;;  %s3987_s3 = inlined_call_operand.hbm [shape: f32[4,8], index: 3, kind: output, shape index: {}]  }
   0x1   :  { %v16_v0 = vld [vmem:[%s3985_s1 + $0x8] sm:$0xff]  ;;  %v17_v1 = vld [vmem:[%s3985_s1 + $0x10] sm:$0xff]  ;;  %v15_v2 = vld [vmem:[%s3985_s1] sm:$0xff]  ;;  %3130 = vmatprep.subr.bf16.mxu1 %v3462_v3 }
   0x2   :  { %v3498_v4 = vpack.c.bf16 %v17_v1, %v16_v0  ;;  %2809 = vmatprep.subr.mxu0 %v15_v2  ;;  %v30_v5 = vld [vmem:[%s3984_s0] sm:$0xff]  ;;  %v31_v6 = vld [vmem:[%s3984_s0 + $0x8] sm:$0xff]  ;;  %v18_v7 = vld [vmem:[%s3985_s1 + $0x18] sm:$0xff] }
   0x3   :  { %2810 = vmatpush3.msra.mxu0 %v15_v2  ;;  %2811 = vmatprep.mubr.msk.f32.mxu0 %vm38_vm0, %v30_v5  ;;  %v19_v8 = vld [vmem:[%s3985_s1 + $0x20] sm:$0xff] }
   0x4   :  { %8 = vsyncpa [#allocation3], 0  ;;  %3132 = vmatpush3.bf16.msra.mxu1 %v3498_v4  ;;  %2812 = vmatmul.mubr.msk.f32.vlgmr.msra.gmra.mrb[0].mxu0 %vm38_vm0, %v31_v6  ;;  %v3515_v9 = vpack.c.bf16 %v19_v8, %v18_v7  ;;  %vm3463_vm1 = vmmov 0   ;;  %v3464_v10 = vmov 0.0   ;;  %v3531_v12 = vld [vmem:[%s3985_s1 + $0x28] ss:$0 sm:$0xff] }
   0x5   :  { %3133 = vmatprep.subr.bf16.mxu1 %v3462_v3  ;;  %2825 = vmatprep.mubr.msk.f32.mxu1 %vm3463_vm1, %v3464_v10  ;;  %s3465_s28 = smov 64   ;;  %s3466_s29 = smov 32   ;;  %v25_v28 = vld [vmem:[%s3985_s1 + $0x50] sm:$0xff]  ;;  %v26_v29 = vld [vmem:[%s3985_s1 + $0x58] sm:$0xff]  ;;  %v27_v33 = vld [vmem:[%s3985_s1 + $0x60] sm:$0xff]  ;;  %vm136_vm2 = vcmask 261120  }
   0x6   :  { %3136 = vmatprep.subr.bf16.mxu0 %v3462_v3  ;;  %v32_v30 = vld [vmem:[%s3984_s0 + $0x10] sm:$0xff]  ;;  %v3551_v31 = vpack.c.bf16 %v26_v29, %v25_v28  ;;  %v33_v32 = vld [vmem:[%s3984_s0 + $0x18] sm:$0xff]  ;;  %v28_v34 = vld [vmem:[%s3985_s1 + $0x68] sm:$0xff]  ;;  %vm2443_vm3 = vcmask 523264   ;;  %s3467_s14 = smov [#allocation2]   ;;  %vm2595_vm4 = vcmask 60416  }
   0x7   :  { %2814 = vmatprep.mubr.msk.f32.mxu0 %vm38_vm0, %v32_v30  ;;  %v21_v35 = vld [vmem:[%s3985_s1 + $0x30] sm:$0xff]  ;;  %v22_v36 = vld [vmem:[%s3985_s1 + $0x38] sm:$0xff]  ;;  %v23_v37 = vld [vmem:[%s3985_s1 + $0x40] sm:$0xff]  ;;  %v3574_v38 = vpack.c.bf16 %v28_v34, %v27_v33  ;;  %s2603_s15 = sshll.u32 %s3467_s14, 4  ;;  %s2604_s15 = int_to_ptr.vmem [resolvable:$true] %s2603_s15 }
   0x8   :  { %3135 = vmatpush3.bf16.msra.mxu1 %v3515_v9  ;;  %2815 = vmatmul.mubr.msk.f32.gmra.mrb[2].mxu0 %vm38_vm0, %v33_v32  ;;  %v3578_v39 = vpack.c.bf16 %v22_v36, %v21_v35  ;;  %v24_v40 = vld [vmem:[%s3985_s1 + $0x48] sm:$0xff]  ;;  %v3622_v50 = vld [vmem:[%s3985_s1 + $0x70] ss:$0 sm:$0xff]  ;;  %s3438_s16 = scalar_lea.vmem %s2604_s15, 64  ;;  %p3443_p1 = scmp.lt.s32.totalorder %s2604_s15, %s2604_s15 }
   0x9   :  { %3142 = vmatprep.subr.bf16.mxu1 %v3462_v3  ;;  %3138 = vmatpush3.bf16.msra.mxu0 %v3551_v31  ;;  %v3585_v41 = vpack.c.bf16 %v24_v40, %v23_v37  ;;  %p3439_p0 = scmp.ne.s32.totalorder %s2604_s15, %s3438_s16  ;;  %p3444_p2 = scmp.lt.s32.totalorder %s3438_s16, %s3438_s16 }
   0xa   :  { %2836 = vmatprep.mubr.msk.f32.mxu0 %vm3463_vm1, %v3464_v10  ;;  %3139 = vmatprep.subr.bf16.mxu0 %v3462_v3 }
   0xb   :  { %2826 = vmatmul.mubr.f32.vlgmr.msra.gmra.mrb[0].mxu1 %v3464_v10  ;;  %p3445_p3 = por %p3444_p2, %p3443_p1 }
   0xc   :  { %2847 = vmatprep.mubr.msk.f32.mxu1 %vm3463_vm1, %v3464_v10  ;;  %3144 = vmatpush3.bf16.msra.mxu1 %v3578_v39 }
   0xd   :  { %3145 = vmatprep.subr.bf16.mxu1 %v3462_v3  ;;  %3141 = vmatpush3.bf16.msra.mxu0 %v3574_v38  ;;  %p3446_p4 = pnand %p3445_p3, %p3439_p0 }
   0xe   :  { %3148 = vmatprep.subr.bf16.mxu0 %v3462_v3 }
  0x10   :  { %3147 = vmatpush3.bf16.msra.mxu1 %v3585_v41  ;;  %2837 = vmatmul.mubr.f32.vlgmr.msra.gmra.mrb[4].mxu0 %v3464_v10 }
  0x11   :  { %3154 = vmatprep.subr.bf16.mxu1 %v3462_v3  ;;  %3150 = vmatpush3.bf16.msra.mxu0 %v3498_v4 }
  0x12   :  { %3151 = vmatprep.subr.bf16.mxu0 %v3462_v3  ;;  %2858 = vmatprep.mubr.msk.f32.mxu0 %vm3463_vm1, %v3464_v10 }
  0x15   :  { %3153 = vmatpush3.bf16.msra.mxu0 %v3515_v9 }
  0x16   :  { %3160 = vmatprep.subr.bf16.mxu0 %v3462_v3 }
  0xd7   :  { %v3526_v11 = vpop.f32.mrb[0].mxu0 }
  0xd8   :  { %v117_v13 = vpop.f32.mrb[1].mxu0  ;;  %v3665_v40 = vadd.f32 %v3526_v11, %v3531_v12 }
  0xd9   :  { %v3534_v14 = vadd.f32 %v3531_v12, %v117_v13 }
  0xdb   :  { %v3601_v45 = vpop.f32.mrb[2].mxu0 }
  0xdc   :  { %v3603_v46 = vpop.f32.mrb[3].mxu0 }
  0xde   :  { %v206_v15 = vpop.f32.mrb[0].mxu1 }
  0xdf   :  { %v210_v16 = vadd.f32 %v206_v15, %v3534_v14  ;;  %v2827_v17 = vpop.f32.mrb[1].mxu1 }
  0xe1   :  { %3310 = vtanh.f32 %v210_v16  ;;  %v2616_v19 = vmul.f32 -1.442695, %v210_v16 }
  0xe3   :  { %3312 = vpow2.f32 %v2616_v19  ;;  %v301_v47 = vpop.f32.mrb[4].mxu0 }
  0xe4   :  { %v2838_v48 = vpop.f32.mrb[5].mxu0 }
  0xeb   :  { %v3311_v18 = vpop.eup %3310 }
  0xec   :  { %220 = vrot.lane.b32.xlu0 %v3311_v18, %s3465_s28 }
  0xed   :  { %v3313_v20 = vpop.eup %3312 }
  0xee   :  { %v214_v21 = vadd.f32 1.0, %v3313_v20 }
  0xf0   :  { %3314 = vrcp.f32 %v214_v21 }
  0xfa   :  { %v3315_v22 = vpop.eup %3314 }
  0xfb   :  { %v218_v25 = vmul.f32 0.0, %v3315_v22 }
 0x15e   :  { %v221_v23 = vpop.permute.xlu0 %220 }
 0x15f   :  { %v223_v24 = vmul.f32 %v3315_v22, %v221_v23 }
 0x161   :  { %225 = vrot.lane.b32.xlu0 %v223_v24, %s3466_s29 }
 0x1d3   :  { %v226_v26 = vpop.permute.xlu0 %225 }
 0x1d4   :  { %v3539_v27 = vadd.f32 %v226_v26, %v218_v25 }
 0x1d6   :  { %3316 = vtanh.f32 %v3539_v27  ;;  %v491_v15 = vrot.slane %v3539_v27, 4 }
 0x1e0   :  { %v3317_v42 = vpop.eup %3316 }
 0x1e1   :  { %231 = vrot.lane.b32.xlu1 %v3317_v42, %s3465_s28 }
 0x253   :  { %v232_v43 = vpop.permute.xlu1 %231 }
 0x254   :  { %v234_v44 = vmul.f32 %v3315_v22, %v232_v43 }
 0x256   :  { %306 = vrot.lane.b32.xlu1 %v234_v44, %s3466_s29 }
 0x2c8   :  { %v307_v49 = vpop.permute.xlu1 %306 }
 0x2c9   :  { %2848 = vmatmul.mubr.msk.f32.vlgmr.msra.gmra.mrb[2].mxu1 %vm136_vm2, %v307_v49  ;;  %2859 = vmatmul.mubr.msk.f32.vlgmr.msra.gmra.mrb[6].mxu0 %vm136_vm2, %v307_v49 }
 0x2ca   :  { %3156 = vmatpush3.bf16.msra.mxu1 %v3551_v31  ;;  %3162 = vmatpush3.bf16.msra.mxu0 %v3578_v39 }
 0x2cb   :  { %3157 = vmatprep.subr.bf16.mxu1 %v3462_v3  ;;  %3163 = vmatprep.subr.bf16.mxu0 %v3462_v3 }
 0x2cc   :  { %2869 = vmatprep.mubr.msk.f32.mxu1 %vm3463_vm1, %v3464_v10  ;;  %2880 = vmatprep.mubr.msk.f32.mxu0 %vm3463_vm1, %v3464_v10 }
 0x2ce   :  { %3159 = vmatpush3.bf16.msra.mxu1 %v3574_v38  ;;  %3165 = vmatpush3.bf16.msra.mxu0 %v3585_v41 }
 0x2cf   :  { %3166 = vmatprep.subr.bf16.mxu1 %v3462_v3  ;;  %3172 = vmatprep.subr.bf16.mxu0 %v3462_v3 }
 0x39c   :  { %v376_v51 = vpop.f32.mrb[2].mxu1  ;;  %v475_v52 = vpop.f32.mrb[6].mxu0 }
 0x39d   :  { %v377_v53 = vadd.f32 %v376_v51, %v301_v47  ;;  %v480_v54 = vrot.slane %v475_v52, 4  ;;  %v2849_v55 = vpop.f32.mrb[3].mxu1  ;;  %v2860_v56 = vpop.f32.mrb[7].mxu0 }
 0x39f   :  { %v384_v57 = vadd.f32 %v3622_v50, %v377_v53  ;;  %v482_v58 = vadd.f32 %v480_v54, %v3534_v14 }
 0x3a1   :  { %3318 = vtanh.f32 %v384_v57  ;;  %v2619_v61 = vmul.f32 -1.442695, %v384_v57  ;;  %v2621_v62 = vmul.f32 -1.442695, %v482_v58 }
 0x3a2   :  { %3320 = vtanh.f32 %v482_v58 }
 0x3a3   :  { %3322 = vpow2.f32 %v2619_v61 }
 0x3a4   :  { %3324 = vpow2.f32 %v2621_v62 }
 0x3ab   :  { %v3319_v59 = vpop.eup %3318 }
 0x3ac   :  { %v3321_v60 = vpop.eup %3320  ;;  %394 = vrot.lane.b32.xlu1 %v3319_v59, %s3465_s28 }
 0x3ad   :  { %495 = vrot.lane.b32.xlu0 %v3321_v60, %s3465_s28  ;;  %v3323_v63 = vpop.eup %3322 }
 0x3ae   :  { %v3325_v0 = vpop.eup %3324  ;;  %v388_v1 = vadd.f32 1.0, %v3323_v63 }
 0x3af   :  { %v486_v2 = vadd.f32 1.0, %v3325_v0 }
 0x3b0   :  { %3326 = vrcp.f32 %v388_v1 }
 0x3b1   :  { %3328 = vrcp.f32 %v486_v2 }
 0x3ba   :  { %v3327_v5 = vpop.eup %3326 }
 0x3bb   :  { %v3329_v7 = vpop.eup %3328  ;;  %v392_v16 = vmul.f32 0.0, %v3327_v5 }
 0x3bc   :  { %v493_v17 = vmul.f32 %v3329_v7, %v491_v15 }
 0x41e   :  { %v395_v6 = vpop.permute.xlu1 %394 }
 0x41f   :  { %v496_v8 = vpop.permute.xlu0 %495  ;;  %v397_v13 = vmul.f32 %v3327_v5, %v395_v6 }
 0x420   :  { %v498_v14 = vmul.f32 %v3329_v7, %v496_v8 }
 0x421   :  { %399 = vrot.lane.b32.xlu1 %v397_v13, %s3466_s29 }
 0x422   :  { %500 = vrot.lane.b32.xlu0 %v498_v14, %s3466_s29 }
 0x493   :  { %v400_v18 = vpop.permute.xlu1 %399 }
 0x494   :  { %v501_v19 = vpop.permute.xlu0 %500  ;;  %v3631_v20 = vadd.f32 %v400_v18, %v392_v16 }
 0x495   :  { %v3633_v21 = vadd.f32 %v501_v19, %v493_v17 }
 0x496   :  { %3330 = vtanh.f32 %v3631_v20 }
 0x497   :  { %3332 = vtanh.f32 %v3633_v21  ;;  %v765_v62 = vrot.slane %v3633_v21, 4 }
 0x4a0   :  { %v3331_v22 = vpop.eup %3330 }
 0x4a1   :  { %v3333_v23 = vpop.eup %3332  ;;  %405 = vrot.lane.b32.xlu1 %v3331_v22, %s3465_s28 }
 0x4a2   :  { %506 = vrot.lane.b32.xlu0 %v3333_v23, %s3465_s28 }
 0x513   :  { %v406_v24 = vpop.permute.xlu1 %405 }
 0x514   :  { %v507_v25 = vpop.permute.xlu0 %506  ;;  %v408_v26 = vmul.f32 %v3327_v5, %v406_v24 }
 0x515   :  { %v509_v27 = vmul.f32 %v3329_v7, %v507_v25 }
 0x516   :  { %511 = vrot.lane.b32.xlu0 %v408_v26, %s3466_s29 }
 0x517   :  { %v586_v28 = vrot.slane %v509_v27, 4 }
 0x519   :  { %587 = vrot.lane.b32.xlu1 %v586_v28, %s3466_s29 }
 0x588   :  { %v512_v29 = vpop.permute.xlu0 %511 }
 0x589   :  { %2870 = vmatmul.mubr.msk.f32.vlgmr.msra.gmra.mrb[4].mxu1 %vm136_vm2, %v512_v29 }
 0x58a   :  { %3168 = vmatpush3.bf16.msra.mxu1 %v3498_v4  ;;  %2891 = vmatprep.mubr.msk.f32.mxu1 %vm3463_vm1, %v3464_v10 }
 0x58b   :  { %v588_v30 = vpop.permute.xlu1 %587  ;;  %3169 = vmatprep.subr.bf16.mxu1 %v3462_v3 }
 0x58c   :  { %2881 = vmatmul.mubr.msk.f32.vlgmr.msra.gmra.mrb[8].mxu0 %vm136_vm2, %v588_v30 }
 0x58d   :  { %3174 = vmatpush3.bf16.msra.mxu0 %v3551_v31  ;;  %2902 = vmatprep.mubr.msk.f32.mxu0 %vm3463_vm1, %v3464_v10 }
 0x58e   :  { %3171 = vmatpush3.bf16.msra.mxu1 %v3515_v9  ;;  %3175 = vmatprep.subr.bf16.mxu0 %v3462_v3 }
 0x58f   :  { %3178 = vmatprep.subr.bf16.mxu1 %v3462_v3 }
 0x591   :  { %2892 = vmatmul.mubr.msk.f32.vlgmr.msra.gmra.mrb[6].mxu1 %vm136_vm2, %v588_v30  ;;  %3177 = vmatpush3.bf16.msra.mxu0 %v3574_v38 }
 0x592   :  { %3180 = vmatpush3.bf16.msra.mxu1 %v3578_v39  ;;  %3184 = vmatprep.subr.bf16.mxu0 %v3462_v3 }
 0x593   :  { %3181 = vmatprep.subr.bf16.mxu1 %v3462_v3  ;;  %2913 = vmatprep.mubr.msk.f32.mxu1 %vm3463_vm1, %v3464_v10 }
 0x596   :  { %3183 = vmatpush3.bf16.msra.mxu1 %v3585_v41 }
 0x597   :  { %3190 = vmatprep.subr.bf16.mxu1 %v3462_v3 }
 0x65c   :  { %v581_v32 = vpop.f32.mrb[4].mxu1 }
 0x65d   :  { %v2871_v33 = vpop.f32.mrb[5].mxu1 }
 0x65f   :  { %v657_v34 = vpop.f32.mrb[8].mxu0 }
 0x660   :  { %v658_v35 = vadd.f32 %v657_v34, %v581_v32  ;;  %v2882_v36 = vpop.f32.mrb[9].mxu0 }
 0x662   :  { %v661_v37 = vadd.f32 %v3622_v50, %v658_v35 }
 0x664   :  { %3334 = vtanh.f32 %v661_v37  ;;  %v752_v42 = vpop.f32.mrb[6].mxu1  ;;  %v2624_v49 = vmul.f32 -1.442695, %v661_v37 }
 0x665   :  { %v756_v43 = vadd.f32 %v752_v42, %v3665_v40  ;;  %v2893_v44 = vpop.f32.mrb[7].mxu1 }
 0x667   :  { %3336 = vtanh.f32 %v756_v43  ;;  %v2626_v51 = vmul.f32 -1.442695, %v756_v43 }
 0x668   :  { %3338 = vpow2.f32 %v2624_v49 }
 0x669   :  { %3340 = vpow2.f32 %v2626_v51 }
 0x66e   :  { %v3335_v47 = vpop.eup %3334 }
 0x66f   :  { %671 = vrot.lane.b32.xlu0 %v3335_v47, %s3465_s28 }
 0x671   :  { %v3337_v48 = vpop.eup %3336 }
 0x672   :  { %769 = vrot.lane.b32.xlu1 %v3337_v48, %s3465_s28  ;;  %v3339_v52 = vpop.eup %3338 }
 0x673   :  { %v3341_v53 = vpop.eup %3340  ;;  %v665_v11 = vadd.f32 1.0, %v3339_v52 }
 0x674   :  { %v760_v54 = vadd.f32 1.0, %v3341_v53 }
 0x675   :  { %3342 = vrcp.f32 %v665_v11 }
 0x676   :  { %3344 = vrcp.f32 %v760_v54 }
 0x67f   :  { %v3343_v55 = vpop.eup %3342 }
 0x680   :  { %v3345_v58 = vpop.eup %3344  ;;  %v669_v61 = vmul.f32 %v3343_v55, %v3631_v20 }
 0x681   :  { %v767_v1 = vmul.f32 %v3345_v58, %v765_v62 }
 0x6e1   :  { %v672_v56 = vpop.permute.xlu0 %671 }
 0x6e2   :  { %v674_v57 = vmul.f32 %v3343_v55, %v672_v56 }
 0x6e4   :  { %676 = vrot.lane.b32.xlu0 %v674_v57, %s3466_s29  ;;  %v770_v59 = vpop.permute.xlu1 %769 }
 0x6e5   :  { %v772_v60 = vmul.f32 %v3345_v58, %v770_v59 }
 0x6e7   :  { %774 = vrot.lane.b32.xlu1 %v772_v60, %s3466_s29 }
 0x756   :  { %v677_v63 = vpop.permute.xlu0 %676 }
 0x757   :  { %v3674_v0 = vadd.f32 %v677_v63, %v669_v61 }
 0x759   :  { %3346 = vtanh.f32 %v3674_v0  ;;  %v775_v2 = vpop.permute.xlu1 %774 }
 0x75a   :  { %v3677_v5 = vadd.f32 %v775_v2, %v767_v1  ;;  %v3746_v2 = vadd.f32 %v3531_v12, %v3603_v46 }
 0x75c   :  { %3348 = vtanh.f32 %v3677_v5  ;;  %v1041_v52 = vrot.slane %v3677_v5, 4 }
 0x763   :  { %v3347_v6 = vpop.eup %3346 }
 0x764   :  { %682 = vrot.lane.b32.xlu0 %v3347_v6, %s3465_s28 }
 0x766   :  { %v3349_v7 = vpop.eup %3348 }
 0x767   :  { %780 = vrot.lane.b32.xlu1 %v3349_v7, %s3465_s28 }
 0x7d6   :  { %v683_v8 = vpop.permute.xlu0 %682 }
 0x7d7   :  { %v685_v13 = vmul.f32 %v3343_v55, %v683_v8 }
 0x7d9   :  { %785 = vrot.lane.b32.xlu0 %v685_v13, %s3466_s29  ;;  %v781_v14 = vpop.permute.xlu1 %780 }
 0x7da   :  { %v783_v15 = vmul.f32 %v3345_v58, %v781_v14 }
 0x7dc   :  { %860 = vrot.lane.b32.xlu1 %v783_v15, %s3466_s29 }
 0x84b   :  { %v786_v16 = vpop.permute.xlu0 %785 }
 0x84c   :  { %2903 = vmatmul.mubr.msk.f32.vlgmr.msra.gmra.mrb[10].mxu0 %vm136_vm2, %v786_v16 }
 0x84d   :  { %3186 = vmatpush3.bf16.msra.mxu0 %v3498_v4  ;;  %2924 = vmatprep.mubr.msk.f32.mxu0 %vm3463_vm1, %v3464_v10 }
 0x84e   :  { %v861_v17 = vpop.permute.xlu1 %860  ;;  %3187 = vmatprep.subr.bf16.mxu0 %v3462_v3 }
 0x84f   :  { %2914 = vmatmul.mubr.msk.f32.vlgmr.msra.gmra.mrb[8].mxu1 %vm136_vm2, %v861_v17 }
 0x850   :  { %3192 = vmatpush3.bf16.msra.mxu1 %v3551_v31  ;;  %2935 = vmatprep.mubr.msk.f32.mxu1 %vm3463_vm1, %v3464_v10 }
 0x851   :  { %3189 = vmatpush3.bf16.msra.mxu0 %v3515_v9  ;;  %3193 = vmatprep.subr.bf16.mxu1 %v3462_v3 }
 0x852   :  { %3196 = vmatprep.subr.bf16.mxu0 %v3462_v3 }
 0x854   :  { %2925 = vmatmul.mubr.msk.f32.vlgmr.msra.gmra.mrb[12].mxu0 %vm136_vm2, %v861_v17  ;;  %3195 = vmatpush3.bf16.msra.mxu1 %v3574_v38 }
 0x855   :  { %3198 = vmatpush3.bf16.msra.mxu0 %v3578_v39  ;;  %3202 = vmatprep.subr.bf16.mxu1 %v3462_v3 }
 0x856   :  { %3199 = vmatprep.subr.bf16.mxu0 %v3462_v3  ;;  %2946 = vmatprep.mubr.msk.f32.mxu0 %vm3463_vm1, %v3464_v10 }
 0x859   :  { %3201 = vmatpush3.bf16.msra.mxu0 %v3585_v41 }
 0x85a   :  { %3208 = vmatprep.subr.bf16.mxu0 %v3462_v3 }
 0x91f   :  { %v855_v18 = vpop.f32.mrb[10].mxu0 }
 0x920   :  { %v2904_v19 = vpop.f32.mrb[11].mxu0 }
 0x922   :  { %v930_v20 = vpop.f32.mrb[8].mxu1 }
 0x923   :  { %v931_v21 = vadd.f32 %v930_v20, %v855_v18  ;;  %v2915_v22 = vpop.f32.mrb[9].mxu1 }
 0x925   :  { %v934_v23 = vadd.f32 %v3622_v50, %v931_v21 }
 0x927   :  { %3350 = vtanh.f32 %v934_v23  ;;  %v1025_v24 = vpop.f32.mrb[12].mxu0  ;;  %v2629_v30 = vmul.f32 -1.442695, %v934_v23 }
 0x928   :  { %v1030_v25 = vrot.slane %v1025_v24, 4  ;;  %v2926_v26 = vpop.f32.mrb[13].mxu0 }
 0x92a   :  { %v1032_v27 = vadd.f32 %v1030_v25, %v3665_v40 }
 0x92c   :  { %3352 = vtanh.f32 %v1032_v27  ;;  %v2631_v32 = vmul.f32 -1.442695, %v1032_v27 }
 0x92d   :  { %3354 = vpow2.f32 %v2629_v30 }
 0x92e   :  { %3356 = vpow2.f32 %v2631_v32 }
 0x931   :  { %v3351_v28 = vpop.eup %3350 }
 0x932   :  { %944 = vrot.lane.b32.xlu1 %v3351_v28, %s3465_s28 }
 0x936   :  { %v3353_v29 = vpop.eup %3352 }
 0x937   :  { %1045 = vrot.lane.b32.xlu0 %v3353_v29, %s3465_s28  ;;  %v3355_v33 = vpop.eup %3354 }
 0x938   :  { %v938_v34 = vadd.f32 1.0, %v3355_v33  ;;  %v3357_v35 = vpop.eup %3356 }
 0x939   :  { %v1036_v36 = vadd.f32 1.0, %v3357_v35 }
 0x93a   :  { %3358 = vrcp.f32 %v938_v34 }
 0x93b   :  { %3360 = vrcp.f32 %v1036_v36 }
 0x944   :  { %v3359_v37 = vpop.eup %3358 }
 0x945   :  { %v3361_v43 = vpop.eup %3360  ;;  %v942_v48 = vmul.f32 %v3359_v37, %v3674_v0 }
 0x946   :  { %v1043_v53 = vmul.f32 %v3361_v43, %v1041_v52 }
 0x9a4   :  { %v945_v42 = vpop.permute.xlu1 %944 }
 0x9a5   :  { %v947_v40 = vmul.f32 %v3359_v37, %v945_v42 }
 0x9a7   :  { %949 = vrot.lane.b32.xlu1 %v947_v40, %s3466_s29 }
 0x9a9   :  { %v1046_v44 = vpop.permute.xlu0 %1045 }
 0x9aa   :  { %v1048_v47 = vmul.f32 %v3361_v43, %v1046_v44 }
 0x9ac   :  { %1050 = vrot.lane.b32.xlu0 %v1048_v47, %s3466_s29 }
 0xa19   :  { %v950_v49 = vpop.permute.xlu1 %949 }
 0xa1a   :  { %v3712_v51 = vadd.f32 %v950_v49, %v942_v48 }
 0xa1c   :  { %3362 = vtanh.f32 %v3712_v51 }
 0xa1e   :  { %v1051_v11 = vpop.permute.xlu0 %1050 }
 0xa1f   :  { %v3716_v54 = vadd.f32 %v1051_v11, %v1043_v53 }
 0xa21   :  { %3364 = vtanh.f32 %v3716_v54  ;;  %v1315_v29 = vrot.slane %v3716_v54, 4 }
 0xa26   :  { %v3363_v55 = vpop.eup %3362 }
 0xa27   :  { %955 = vrot.lane.b32.xlu1 %v3363_v55, %s3465_s28 }
 0xa2b   :  { %v3365_v56 = vpop.eup %3364 }
 0xa2c   :  { %1056 = vrot.lane.b32.xlu0 %v3365_v56, %s3465_s28 }
 0xa99   :  { %v956_v57 = vpop.permute.xlu1 %955 }
 0xa9a   :  { %v958_v58 = vmul.f32 %v3359_v37, %v956_v57 }
 0xa9c   :  { %1061 = vrot.lane.b32.xlu0 %v958_v58, %s3466_s29 }
 0xa9e   :  { %v1057_v59 = vpop.permute.xlu0 %1056 }
 0xa9f   :  { %v1059_v60 = vmul.f32 %v3361_v43, %v1057_v59 }
 0xaa1   :  { %v1136_v61 = vrot.slane %v1059_v60, 4 }
 0xaa3   :  { %1137 = vrot.lane.b32.xlu1 %v1136_v61, %s3466_s29 }
 0xb0e   :  { %v1062_v62 = vpop.permute.xlu0 %1061 }
 0xb0f   :  { %2936 = vmatmul.mubr.msk.f32.vlgmr.msra.gmra.mrb[10].mxu1 %vm136_vm2, %v1062_v62 }
 0xb10   :  { %3204 = vmatpush3.bf16.msra.mxu1 %v3498_v4  ;;  %2957 = vmatprep.mubr.msk.f32.mxu1 %vm3463_vm1, %v3464_v10 }
 0xb11   :  { %3205 = vmatprep.subr.bf16.mxu1 %v3462_v3 }
 0xb14   :  { %3207 = vmatpush3.bf16.msra.mxu1 %v3515_v9 }
 0xb15   :  { %v1138_v63 = vpop.permute.xlu1 %1137  ;;  %3214 = vmatprep.subr.bf16.mxu1 %v3462_v3 }
 0xb16   :  { %2947 = vmatmul.mubr.msk.f32.vlgmr.msra.gmra.mrb[14].mxu0 %vm136_vm2, %v1138_v63 }
 0xb17   :  { %2958 = vmatmul.mubr.msk.f32.vlgmr.msra.gmra.mrb[12].mxu1 %vm136_vm2, %v1138_v63  ;;  %3210 = vmatpush3.bf16.msra.mxu0 %v3551_v31 }
 0xb18   :  { %3216 = vmatpush3.bf16.msra.mxu1 %v3578_v39  ;;  %3211 = vmatprep.subr.bf16.mxu0 %v3462_v3 }
 0xb19   :  { %3217 = vmatprep.subr.bf16.mxu1 %v3462_v3  ;;  %2979 = vmatprep.mubr.msk.f32.mxu1 %vm3463_vm1, %v3464_v10 }
 0xb1a   :  { %2968 = vmatprep.mubr.msk.f32.mxu0 %vm3463_vm1, %v3464_v10 }
 0xb1b   :  { %3213 = vmatpush3.bf16.msra.mxu0 %v3574_v38 }
 0xb1c   :  { %3219 = vmatpush3.bf16.msra.mxu1 %v3585_v41  ;;  %3220 = vmatprep.subr.bf16.mxu0 %v3462_v3 }
 0xb1d   :  { %3226 = vmatprep.subr.bf16.mxu1 %v3462_v3 }
 0xbe2   :  { %v1131_v0 = vpop.f32.mrb[10].mxu1 }
 0xbe3   :  { %v2937_v1 = vpop.f32.mrb[11].mxu1 }
 0xbe9   :  { %v1207_v5 = vpop.f32.mrb[14].mxu0 }
 0xbea   :  { %v1208_v6 = vadd.f32 %v1207_v5, %v1131_v0  ;;  %v2948_v7 = vpop.f32.mrb[15].mxu0  ;;  %v1302_v8 = vpop.f32.mrb[12].mxu1 }
 0xbeb   :  { %v1306_v13 = vadd.f32 %v1302_v8, %v3746_v2  ;;  %v2959_v14 = vpop.f32.mrb[13].mxu1 }
 0xbec   :  { %v1211_v15 = vadd.f32 %v3622_v50, %v1208_v6 }
 0xbed   :  { %3366 = vtanh.f32 %v1306_v13  ;;  %v2636_v18 = vmul.f32 -1.442695, %v1306_v13 }
 0xbee   :  { %3368 = vtanh.f32 %v1211_v15  ;;  %v2634_v46 = vmul.f32 -1.442695, %v1211_v15 }
 0xbef   :  { %3370 = vpow2.f32 %v2636_v18 }
 0xbf0   :  { %3372 = vpow2.f32 %v2634_v46 }
 0xbf7   :  { %v3367_v16 = vpop.eup %3366 }
 0xbf8   :  { %v3369_v17 = vpop.eup %3368  ;;  %1319 = vrot.lane.b32.xlu1 %v3367_v16, %s3465_s28 }
 0xbf9   :  { %1221 = vrot.lane.b32.xlu0 %v3369_v17, %s3465_s28  ;;  %v3371_v19 = vpop.eup %3370 }
 0xbfa   :  { %v3373_v20 = vpop.eup %3372  ;;  %v1310_v21 = vadd.f32 1.0, %v3371_v19 }
 0xbfb   :  { %v1215_v22 = vadd.f32 1.0, %v3373_v20 }
 0xbfc   :  { %3374 = vrcp.f32 %v1310_v21 }
 0xbfd   :  { %3376 = vrcp.f32 %v1215_v22 }
 0xc06   :  { %v3375_v23 = vpop.eup %3374 }
 0xc07   :  { %v3377_v25 = vpop.eup %3376  ;;  %v1317_v30 = vmul.f32 %v3375_v23, %v1315_v29 }
 0xc08   :  { %v1219_v33 = vmul.f32 %v3377_v25, %v3712_v51 }
 0xc6a   :  { %v1320_v24 = vpop.permute.xlu1 %1319 }
 0xc6b   :  { %v1322_v26 = vmul.f32 %v3375_v23, %v1320_v24  ;;  %v1222_v27 = vpop.permute.xlu0 %1221 }
 0xc6c   :  { %v1224_v28 = vmul.f32 %v3377_v25, %v1222_v27 }
 0xc6d   :  { %1324 = vrot.lane.b32.xlu1 %v1322_v26, %s3466_s29 }
 0xc6e   :  { %1226 = vrot.lane.b32.xlu0 %v1224_v28, %s3466_s29 }
 0xcdf   :  { %v1325_v32 = vpop.permute.xlu1 %1324 }
 0xce0   :  { %v3756_v34 = vadd.f32 %v1325_v32, %v1317_v30  ;;  %v1227_v35 = vpop.permute.xlu0 %1226 }
 0xce1   :  { %v3758_v36 = vadd.f32 %v1227_v35, %v1219_v33 }
 0xce2   :  { %3378 = vtanh.f32 %v3756_v34  ;;  %v1591_v46 = vrot.slane %v3756_v34, 4  ;;  %v3828_v34 = vadd.f32 %v3601_v45, %v3531_v12 }
 0xce3   :  { %3380 = vtanh.f32 %v3758_v36 }
 0xcec   :  { %v3379_v37 = vpop.eup %3378 }
 0xced   :  { %v3381_v42 = vpop.eup %3380  ;;  %1330 = vrot.lane.b32.xlu1 %v3379_v37, %s3465_s28 }
 0xcee   :  { %1232 = vrot.lane.b32.xlu0 %v3381_v42, %s3465_s28 }
 0xd5f   :  { %v1331_v40 = vpop.permute.xlu1 %1330 }
 0xd60   :  { %v1333_v43 = vmul.f32 %v3375_v23, %v1331_v40  ;;  %v1233_v44 = vpop.permute.xlu0 %1232 }
 0xd61   :  { %v1235_v47 = vmul.f32 %v3377_v25, %v1233_v44 }
 0xd62   :  { %1410 = vrot.lane.b32.xlu1 %v1333_v43, %s3466_s29 }
 0xd63   :  { %1335 = vrot.lane.b32.xlu0 %v1235_v47, %s3466_s29 }
 0xdd4   :  { %v1411_v48 = vpop.permute.xlu1 %1410 }
 0xdd5   :  { %v1336_v49 = vpop.permute.xlu0 %1335  ;;  %2980 = vmatmul.mubr.msk.f32.vlgmr.msra.gmra.mrb[14].mxu1 %vm136_vm2, %v1411_v48 }
 0xdd6   :  { %2969 = vmatmul.mubr.msk.f32.vlgmr.msra.gmra.mrb[16].mxu0 %vm136_vm2, %v1336_v49  ;;  %3228 = vmatpush3.bf16.msra.mxu1 %v3551_v31 }
 0xdd7   :  { %3222 = vmatpush3.bf16.msra.mxu0 %v3498_v4  ;;  %2990 = vmatprep.mubr.msk.f32.mxu0 %vm3463_vm1, %v3464_v10 }
 0xdd8   :  { %3223 = vmatprep.subr.bf16.mxu0 %v3462_v3  ;;  %3229 = vmatprep.subr.bf16.mxu1 %v3462_v3 }
 0xdd9   :  { %3001 = vmatprep.mubr.msk.f32.mxu1 %vm3463_vm1, %v3464_v10 }
 0xdda   :  { %3231 = vmatpush3.bf16.msra.mxu1 %v3574_v38 }
 0xddb   :  { %3225 = vmatpush3.bf16.msra.mxu0 %v3515_v9  ;;  %3238 = vmatprep.subr.bf16.mxu1 %v3462_v3 }
 0xddc   :  { %3232 = vmatprep.subr.bf16.mxu0 %v3462_v3 }
 0xdde   :  { %2991 = vmatmul.mubr.msk.f32.vlgmr.msra.gmra.mrb[18].mxu0 %vm136_vm2, %v1411_v48 }
 0xddf   :  { %3234 = vmatpush3.bf16.msra.mxu0 %v3578_v39  ;;  %3012 = vmatprep.mubr.msk.f32.mxu0 %vm3463_vm1, %v3464_v10 }
 0xde0   :  { %3235 = vmatprep.subr.bf16.mxu0 %v3462_v3 }
 0xde3   :  { %3237 = vmatpush3.bf16.msra.mxu0 %v3585_v41 }
 0xde4   :  { %3244 = vmatprep.subr.bf16.mxu0 %v3462_v3 }
 0xea8   :  { %v1480_v51 = vpop.f32.mrb[14].mxu1 }
 0xea9   :  { %v1405_v52 = vpop.f32.mrb[16].mxu0  ;;  %v2981_v53 = vpop.f32.mrb[15].mxu1 }
 0xeaa   :  { %v1481_v11 = vadd.f32 %v1480_v51, %v1405_v52  ;;  %v2970_v54 = vpop.f32.mrb[17].mxu0 }
 0xeac   :  { %v1484_v55 = vadd.f32 %v3622_v50, %v1481_v11 }
 0xeae   :  { %3382 = vtanh.f32 %v1484_v55  ;;  %v2639_v62 = vmul.f32 -1.442695, %v1484_v55 }
 0xeb1   :  { %v1575_v56 = vpop.f32.mrb[18].mxu0 }
 0xeb2   :  { %v1580_v57 = vrot.slane %v1575_v56, 4  ;;  %v2992_v58 = vpop.f32.mrb[19].mxu0 }
 0xeb4   :  { %v1582_v59 = vadd.f32 %v1580_v57, %v3746_v2 }
 0xeb6   :  { %3384 = vtanh.f32 %v1582_v59  ;;  %v2641_v63 = vmul.f32 -1.442695, %v1582_v59 }
 0xeb7   :  { %3386 = vpow2.f32 %v2639_v62 }
 0xeb8   :  { %v3383_v60 = vpop.eup %3382  ;;  %3388 = vpow2.f32 %v2641_v63 }
 0xeb9   :  { %1494 = vrot.lane.b32.xlu1 %v3383_v60, %s3465_s28 }
 0xec0   :  { %v3385_v61 = vpop.eup %3384 }
 0xec1   :  { %1595 = vrot.lane.b32.xlu0 %v3385_v61, %s3465_s28  ;;  %v3387_v0 = vpop.eup %3386 }
 0xec2   :  { %v1488_v1 = vadd.f32 1.0, %v3387_v0  ;;  %v3389_v5 = vpop.eup %3388 }
 0xec3   :  { %v1586_v6 = vadd.f32 1.0, %v3389_v5 }
 0xec4   :  { %3390 = vrcp.f32 %v1488_v1 }
 0xec5   :  { %3392 = vrcp.f32 %v1586_v6 }
 0xece   :  { %v3391_v7 = vpop.eup %3390 }
 0xecf   :  { %v3393_v13 = vpop.eup %3392  ;;  %v1492_v16 = vmul.f32 %v3391_v7, %v3758_v36 }
 0xed0   :  { %v1593_v19 = vmul.f32 %v3393_v13, %v1591_v46 }
 0xf2b   :  { %v1495_v8 = vpop.permute.xlu1 %1494 }
 0xf2c   :  { %v1497_v2 = vmul.f32 %v3391_v7, %v1495_v8 }
 0xf2e   :  { %1499 = vrot.lane.b32.xlu1 %v1497_v2, %s3466_s29 }
 0xf33   :  { %v1596_v14 = vpop.permute.xlu0 %1595 }
 0xf34   :  { %v1598_v15 = vmul.f32 %v3393_v13, %v1596_v14 }
 0xf36   :  { %1600 = vrot.lane.b32.xlu0 %v1598_v15, %s3466_s29 }
 0xfa0   :  { %v1500_v17 = vpop.permute.xlu1 %1499 }
 0xfa1   :  { %v3794_v18 = vadd.f32 %v1500_v17, %v1492_v16 }
 0xfa3   :  { %3394 = vtanh.f32 %v3794_v18 }
 0xfa8   :  { %v1601_v20 = vpop.permute.xlu0 %1600 }
 0xfa9   :  { %v3798_v21 = vadd.f32 %v1601_v20, %v1593_v19 }
 0xfab   :  { %3396 = vtanh.f32 %v3798_v21  ;;  %v1865_v59 = vrot.slane %v3798_v21, 4 }
 0xfad   :  { %v3395_v22 = vpop.eup %3394 }
 0xfae   :  { %1505 = vrot.lane.b32.xlu1 %v3395_v22, %s3465_s28 }
 0xfb5   :  { %v3397_v23 = vpop.eup %3396 }
 0xfb6   :  { %1606 = vrot.lane.b32.xlu0 %v3397_v23, %s3465_s28 }
0x1020   :  { %v1506_v24 = vpop.permute.xlu1 %1505 }
0x1021   :  { %v1508_v25 = vmul.f32 %v3391_v7, %v1506_v24 }
0x1023   :  { %1611 = vrot.lane.b32.xlu0 %v1508_v25, %s3466_s29 }
0x1028   :  { %v1607_v26 = vpop.permute.xlu0 %1606 }
0x1029   :  { %v1609_v27 = vmul.f32 %v3393_v13, %v1607_v26 }
0x102b   :  { %v1686_v28 = vrot.slane %v1609_v27, 4 }
0x102d   :  { %1687 = vrot.lane.b32.xlu1 %v1686_v28, %s3466_s29 }
0x1095   :  { %v1612_v29 = vpop.permute.xlu0 %1611 }
0x1096   :  { %3002 = vmatmul.mubr.msk.f32.vlgmr.msra.gmra.mrb[16].mxu1 %vm136_vm2, %v1612_v29 }
0x1097   :  { %3240 = vmatpush3.bf16.msra.mxu1 %v3498_v4  ;;  %3023 = vmatprep.mubr.msk.f32.mxu1 %vm3463_vm1, %v3464_v10 }
0x1098   :  { %3241 = vmatprep.subr.bf16.mxu1 %v3462_v3 }
0x109b   :  { %3243 = vmatpush3.bf16.msra.mxu1 %v3515_v9 }
0x109c   :  { %3250 = vmatprep.subr.bf16.mxu1 %v3462_v3 }
0x109f   :  { %v1688_v30 = vpop.permute.xlu1 %1687 }
0x10a0   :  { %3013 = vmatmul.mubr.msk.f32.vlgmr.msra.gmra.mrb[20].mxu0 %vm136_vm2, %v1688_v30  ;;  %3024 = vmatmul.mubr.msk.f32.vlgmr.msra.gmra.mrb[18].mxu1 %vm136_vm2, %v1688_v30 }
0x10a1   :  { %3252 = vmatpush3.bf16.msra.mxu1 %v3578_v39  ;;  %3246 = vmatpush3.bf16.msra.mxu0 %v3551_v31 }
0x10a2   :  { %3253 = vmatprep.subr.bf16.mxu1 %v3462_v3  ;;  %3247 = vmatprep.subr.bf16.mxu0 %v3462_v3 }
0x10a3   :  { %3045 = vmatprep.mubr.msk.f32.mxu1 %vm3463_vm1, %v3464_v10  ;;  %3034 = vmatprep.mubr.msk.f32.mxu0 %vm3463_vm1, %v3464_v10 }
0x10a5   :  { %3255 = vmatpush3.bf16.msra.mxu1 %v3585_v41  ;;  %3249 = vmatpush3.bf16.msra.mxu0 %v3574_v38 }
0x10a6   :  { %3256 = vmatprep.subr.bf16.mxu0 %v3462_v3  ;;  %3262 = vmatprep.subr.bf16.mxu1 %v3462_v3 }
0x1169   :  { %v1681_v32 = vpop.f32.mrb[16].mxu1 }
0x116a   :  { %v3003_v33 = vpop.f32.mrb[17].mxu1 }
0x1173   :  { %v1757_v35 = vpop.f32.mrb[20].mxu0  ;;  %v1852_v36 = vpop.f32.mrb[18].mxu1 }
0x1174   :  { %v1758_v37 = vadd.f32 %v1757_v35, %v1681_v32  ;;  %v1856_v42 = vadd.f32 %v1852_v36, %v3828_v34  ;;  %v3014_v40 = vpop.f32.mrb[21].mxu0  ;;  %v3025_v43 = vpop.f32.mrb[19].mxu1 }
0x1176   :  { %v1761_v44 = vadd.f32 %v3622_v50, %v1758_v37  ;;  %3398 = vtanh.f32 %v1856_v42  ;;  %v2646_v49 = vmul.f32 -1.442695, %v1856_v42 }
0x1178   :  { %3400 = vtanh.f32 %v1761_v44  ;;  %v2644_v12 = vmul.f32 -1.442695, %v1761_v44 }
0x1179   :  { %3402 = vpow2.f32 %v2646_v49 }
0x117a   :  { %3404 = vpow2.f32 %v2644_v12 }
0x1180   :  { %v3399_v47 = vpop.eup %3398 }
0x1181   :  { %1869 = vrot.lane.b32.xlu1 %v3399_v47, %s3465_s28 }
0x1182   :  { %v3401_v48 = vpop.eup %3400 }
0x1183   :  { %1771 = vrot.lane.b32.xlu0 %v3401_v48, %s3465_s28  ;;  %v3403_v45 = vpop.eup %3402 }
0x1184   :  { %v3405_v51 = vpop.eup %3404  ;;  %v1860_v52 = vadd.f32 1.0, %v3403_v45 }
0x1185   :  { %v1765_v53 = vadd.f32 1.0, %v3405_v51 }
0x1186   :  { %3406 = vrcp.f32 %v1860_v52 }
0x1187   :  { %3408 = vrcp.f32 %v1765_v53 }
0x1190   :  { %v3407_v11 = vpop.eup %3406 }
0x1191   :  { %v3409_v56 = vpop.eup %3408  ;;  %v1867_v60 = vmul.f32 %v3407_v11, %v1865_v59 }
0x1192   :  { %v1769_v63 = vmul.f32 %v3409_v56, %v3794_v18 }
0x11f3   :  { %v1870_v54 = vpop.permute.xlu1 %1869 }
0x11f4   :  { %v1872_v55 = vmul.f32 %v3407_v11, %v1870_v54 }
0x11f5   :  { %v1772_v57 = vpop.permute.xlu0 %1771 }
0x11f6   :  { %v1774_v58 = vmul.f32 %v3409_v56, %v1772_v57  ;;  %1874 = vrot.lane.b32.xlu1 %v1872_v55, %s3466_s29 }
0x11f8   :  { %1776 = vrot.lane.b32.xlu0 %v1774_v58, %s3466_s29 }
0x1268   :  { %v1875_v61 = vpop.permute.xlu1 %1874 }
0x1269   :  { %v3837_v62 = vadd.f32 %v1875_v61, %v1867_v60 }
0x126a   :  { %v1777_v0 = vpop.permute.xlu0 %1776 }
0x126b   :  { %3410 = vtanh.f32 %v3837_v62  ;;  %v3841_v1 = vadd.f32 %v1777_v0, %v1769_v63  ;;  %v2141_v37 = vrot.slane %v3837_v62, 4 }
0x126d   :  { %3412 = vtanh.f32 %v3841_v1 }
0x1275   :  { %v3411_v5 = vpop.eup %3410 }
0x1276   :  { %1880 = vrot.lane.b32.xlu1 %v3411_v5, %s3465_s28 }
0x1277   :  { %v3413_v6 = vpop.eup %3412 }
0x1278   :  { %1782 = vrot.lane.b32.xlu0 %v3413_v6, %s3465_s28 }
0x12e8   :  { %v1881_v7 = vpop.permute.xlu1 %1880 }
0x12e9   :  { %v1883_v8 = vmul.f32 %v3407_v11, %v1881_v7 }
0x12ea   :  { %v1783_v2 = vpop.permute.xlu0 %1782 }
0x12eb   :  { %v1785_v13 = vmul.f32 %v3409_v56, %v1783_v2  ;;  %1960 = vrot.lane.b32.xlu1 %v1883_v8, %s3466_s29  ;;  %v2337_v8 = vld [vmem:[%s3986_s2 + $0x8] sm:$0xff]  ;;  %v2338_v2 = vld [vmem:[%s3986_s2 + $0x10] sm:$0xff] }
0x12ed   :  { %1885 = vrot.lane.b32.xlu0 %v1785_v13, %s3466_s29 }
0x135d   :  { %v1961_v14 = vpop.permute.xlu1 %1960 }
0x135e   :  { %3046 = vmatmul.mubr.msk.f32.vlgmr.msra.gmra.mrb[20].mxu1 %vm136_vm2, %v1961_v14 }
0x135f   :  { %v1886_v15 = vpop.permute.xlu0 %1885  ;;  %3264 = vmatpush3.bf16.msra.mxu1 %v3551_v31  ;;  %3067 = vmatprep.mubr.msk.f32.mxu1 %vm3463_vm1, %v3464_v10 }
0x1360   :  { %3035 = vmatmul.mubr.msk.f32.vlgmr.msra.gmra.mrb[22].mxu0 %vm136_vm2, %v1886_v15  ;;  %3265 = vmatprep.subr.bf16.mxu1 %v3462_v3 }
0x1361   :  { %3258 = vmatpush3.bf16.msra.mxu0 %v3498_v4  ;;  %3056 = vmatprep.mubr.msk.f32.mxu0 %vm3463_vm1, %v3464_v10 }
0x1362   :  { %3259 = vmatprep.subr.bf16.mxu0 %v3462_v3 }
0x1363   :  { %3267 = vmatpush3.bf16.msra.mxu1 %v3574_v38 }
0x1364   :  { %3274 = vmatprep.subr.bf16.mxu1 %v3462_v3 }
0x1365   :  { %3261 = vmatpush3.bf16.msra.mxu0 %v3515_v9 }
0x1366   :  { %3268 = vmatprep.subr.bf16.mxu0 %v3462_v3 }
0x1368   :  { %3057 = vmatmul.mubr.msk.f32.vlgmr.msra.gmra.mrb[24].mxu0 %vm136_vm2, %v1961_v14  ;;  %v2339_v14 = vld [vmem:[%s3986_s2 + $0x18] sm:$0xff] }
0x1369   :  { %3270 = vmatpush3.bf16.msra.mxu0 %v3578_v39  ;;  %3078 = vmatprep.mubr.msk.f32.mxu0 %vm3463_vm1, %v3464_v10  ;;  %v3278_v15 = vpack.c.bf16 %v2339_v14, %v2338_v2 }
0x136a   :  { %3271 = vmatprep.subr.bf16.mxu0 %v3462_v3 }
0x136d   :  { %3273 = vmatpush3.bf16.msra.mxu0 %v3585_v41 }
0x136e   :  { %3280 = vmatprep.subr.bf16.mxu0 %v3462_v3 }
0x1431   :  { %v2030_v4 = vpop.f32.mrb[20].mxu1 }
0x1432   :  { %v3047_v31 = vpop.f32.mrb[21].mxu1 }
0x1433   :  { %v1955_v38 = vpop.f32.mrb[22].mxu0  ;;  %v2341_v31 = vld [vmem:[%s3986_s2 + $0x28] sm:$0xff] }
0x1434   :  { %v2031_v16 = vadd.f32 %v2030_v4, %v1955_v38  ;;  %v3036_v9 = vpop.f32.mrb[23].mxu0  ;;  %v2342_v38 = vld [vmem:[%s3986_s2 + $0x30] sm:$0xff] }
0x1435   :  { %v3281_v9 = vpack.c.bf16 %v2342_v38, %v2341_v31 }
0x1436   :  { %v2034_v17 = vadd.f32 %v3622_v50, %v2031_v16  ;;  %v2343_v16 = vld [vmem:[%s3986_s2 + $0x38] sm:$0xff] }
0x1438   :  { %3414 = vtanh.f32 %v2034_v17  ;;  %v2649_v21 = vmul.f32 -1.442695, %v2034_v17  ;;  %v2344_v17 = vld [vmem:[%s3986_s2 + $0x40] sm:$0xff] }
0x143b   :  { %v2125_v18 = vpop.f32.mrb[24].mxu0 }
0x143c   :  { %v2130_v46 = vrot.slane %v2125_v18, 4  ;;  %v3058_v39 = vpop.f32.mrb[25].mxu0  ;;  %v3284_v18 = vpack.c.bf16 %v2344_v17, %v2343_v16 }
0x143d   :  { %v2346_v39 = vld [vmem:[%s3986_s2 + $0x50] sm:$0xff] }
0x143e   :  { %v2132_v19 = vadd.f32 %v2130_v46, %v3828_v34  ;;  %v2345_v46 = vld [vmem:[%s3986_s2 + $0x48] sm:$0xff] }
0x1440   :  { %3416 = vtanh.f32 %v2132_v19  ;;  %v2651_v22 = vmul.f32 -1.442695, %v2132_v19  ;;  %v3287_v19 = vpack.c.bf16 %v2346_v39, %v2345_v46 }
0x1441   :  { %3418 = vpow2.f32 %v2649_v21 }
0x1442   :  { %v3415_v20 = vpop.eup %3414  ;;  %3420 = vpow2.f32 %v2651_v22  ;;  %v2347_v22 = vld [vmem:[%s3986_s2 + $0x58] sm:$0xff] }
0x1443   :  { %2044 = vrot.lane.b32.xlu1 %v3415_v20, %s3465_s28 }
0x144a   :  { %v3417_v41 = vpop.eup %3416 }
0x144b   :  { %2145 = vrot.lane.b32.xlu0 %v3417_v41, %s3465_s28  ;;  %v3419_v23 = vpop.eup %3418 }
0x144c   :  { %v2038_v24 = vadd.f32 1.0, %v3419_v23  ;;  %v3421_v25 = vpop.eup %3420  ;;  %v2348_v23 = vld [vmem:[%s3986_s2 + $0x60] sm:$0xff] }
0x144d   :  { %v2136_v26 = vadd.f32 1.0, %v3421_v25  ;;  %v2350_v25 = vld [vmem:[%s3986_s2 + $0x70] sm:$0xff] }
0x144e   :  { %3422 = vrcp.f32 %v2038_v24  ;;  %v3290_v24 = vpack.c.bf16 %v2348_v23, %v2347_v22 }
0x144f   :  { %3424 = vrcp.f32 %v2136_v26  ;;  %v2351_v26 = vld [vmem:[%s3986_s2 + $0x78] sm:$0xff] }
0x1458   :  { %v3423_v27 = vpop.eup %3422 }
0x1459   :  { %v3425_v30 = vpop.eup %3424  ;;  %v2042_v34 = vmul.f32 %v3423_v27, %v3841_v1 }
0x145a   :  { %v2143_v42 = vmul.f32 %v3425_v30, %v2141_v37 }
0x14b5   :  { %v2045_v28 = vpop.permute.xlu1 %2044 }
0x14b6   :  { %v2047_v29 = vmul.f32 %v3423_v27, %v2045_v28  ;;  %v2353_v28 = vld [vmem:[%s3986_s2 + $0x88] sm:$0xff] }
0x14b8   :  { %2049 = vrot.lane.b32.xlu1 %v2047_v29, %s3466_s29 }
0x14bd   :  { %v2146_v32 = vpop.permute.xlu0 %2145 }
0x14be   :  { %v2148_v33 = vmul.f32 %v3425_v30, %v2146_v32  ;;  %v2355_v32 = vld [vmem:[%s3986_s2 + $0x98] sm:$0xff] }
0x14c0   :  { %2150 = vrot.lane.b32.xlu0 %v2148_v33, %s3466_s29 }
0x152a   :  { %v2050_v35 = vpop.permute.xlu1 %2049 }
0x152b   :  { %v2052_v36 = vadd.f32 %v2050_v35, %v2042_v34  ;;  %v2655_v34 = vld [vmem:[%s3986_s2 + $0x20] ss:$0 sm:$0xff] }
0x152d   :  { %3426 = vtanh.f32 %v2052_v36 }
0x1532   :  { %v2151_v40 = vpop.permute.xlu0 %2150 }
0x1533   :  { %v2153_v43 = vadd.f32 %v2151_v40, %v2143_v42  ;;  %v2356_v40 = vld [vmem:[%s3986_s2 + $0xa0] sm:$0xff] }
0x1535   :  { %3428 = vtanh.f32 %v2153_v43  ;;  %v2357_v43 = vld [vmem:[%s3986_s2 + $0xa8] sm:$0xff] }
0x1537   :  { %v3427_v44 = vpop.eup %3426 }
0x1538   :  { %2055 = vrot.lane.b32.xlu1 %v3427_v44, %s3465_s28  ;;  %v3302_v44 = vpack.c.bf16 %v2357_v43, %v2356_v40 }
0x153f   :  { %v3429_v47 = vpop.eup %3428 }
0x1540   :  { %2156 = vrot.lane.b32.xlu0 %v3429_v47, %s3465_s28 }
0x15aa   :  { %v2056_v48 = vpop.permute.xlu1 %2055 }
0x15ab   :  { %v2058_v49 = vmul.f32 %v3423_v27, %v2056_v48  ;;  %v3293_v27 = vpack.c.bf16 %v2351_v26, %v2350_v25 }
0x15ad   :  { %2161 = vrot.lane.b32.xlu0 %v2058_v49, %s3466_s29 }
0x15b2   :  { %v2157_v12 = vpop.permute.xlu0 %2156 }
0x15b3   :  { %v2159_v45 = vmul.f32 %v3425_v30, %v2157_v12  ;;  %v2354_v30 = vld [vmem:[%s3986_s2 + $0x90] sm:$0xff] }
0x15b4   :  { %v3299_v33 = vpack.c.bf16 %v2355_v32, %v2354_v30 }
0x15b5   :  { %v2236_v51 = vrot.slane %v2159_v45, 4  ;;  %v2659_v45 = vld [vmem:[%s3986_s2 + $0xb0] ss:$0 sm:$0xff] }
0x15b7   :  { %2237 = vrot.lane.b32.xlu1 %v2236_v51, %s3466_s29 }
0x161f   :  { %v2162_v52 = vpop.permute.xlu0 %2161 }
0x1620   :  { %3068 = vmatmul.mubr.msk.f32.vlgmr.msra.gmra.mrb[22].mxu1 %vm136_vm2, %v2162_v52 }
0x1621   :  { %3089 = vmatprep.mubr.msk.f32.mxu1 %vm3463_vm1, %v3464_v10 }
0x1629   :  { %v2238_v53 = vpop.permute.xlu1 %2237 }
0x162a   :  { %3079 = vmatmul.mubr.msk.f32.vlgmr.msra.gmra.mrb[26].mxu0 %vm136_vm2, %v2238_v53 }
0x162b   :  { %3108 = vmatprep.mubr.msk.f32.mxu0 %vm3463_vm1, %v3464_v10  ;;  %3282 = vmatpush3.bf16.msra.mxu0 %v3281_v9 }
0x162c   :  { %3283 = vmatprep.subr.bf16.mxu0 %v3462_v3 }
0x162f   :  { %3285 = vmatpush3.bf16.msra.mxu0 %v3284_v18 }
0x1630   :  { %3286 = vmatprep.subr.bf16.mxu0 %v3462_v3 }
0x1633   :  { %3288 = vmatpush3.bf16.msra.mxu0 %v3287_v19 }
0x1634   :  { %3289 = vmatprep.subr.bf16.mxu0 %v3462_v3 }
0x1637   :  { %3291 = vmatpush3.bf16.msra.mxu0 %v3290_v24 }
0x16f3   :  { %v2231_v11 = vpop.f32.mrb[22].mxu1 }
0x16f4   :  { %v3069_v54 = vpop.f32.mrb[23].mxu1 }
0x16fd   :  { %v2307_v55 = vpop.f32.mrb[26].mxu0 }
0x16fe   :  { %v2308_v56 = vadd.f32 %v2307_v55, %v2231_v11  ;;  %v3080_v57 = vpop.f32.mrb[27].mxu0 }
0x1700   :  { %v2311_v58 = vadd.f32 %v3622_v50, %v2308_v56  ;;  %v2336_v50 = vld [vmem:[%s3986_s2] sm:$0xff] }
0x1701   :  { %v3275_v13 = vpack.c.bf16 %v2337_v8, %v2336_v50 }
0x1702   :  { %3430 = vtanh.f32 %v2311_v58  ;;  %v2654_v60 = vmul.f32 -1.442695, %v2311_v58 }
0x1703   :  { %3276 = vmatpush3.bf16.msra.mxu1 %v3275_v13 }
0x1704   :  { %3432 = vpow2.f32 %v2654_v60  ;;  %3277 = vmatprep.subr.bf16.mxu1 %v3462_v3 }
0x1707   :  { %3279 = vmatpush3.bf16.msra.mxu1 %v3278_v15 }
0x1708   :  { %3292 = vmatprep.subr.bf16.mxu1 %v3462_v3 }
0x170c   :  { %v3431_v59 = vpop.eup %3430 }
0x170d   :  { %2321 = vrot.lane.b32.xlu0 %v3431_v59, %s3465_s28 }
0x170e   :  { %v3433_v61 = vpop.eup %3432 }
0x170f   :  { %v2315_v62 = vadd.f32 1.0, %v3433_v61 }
0x1711   :  { %3434 = vrcp.f32 %v2315_v62 }
0x171b   :  { %v3435_v63 = vpop.eup %3434 }
0x171c   :  { %v2319_v5 = vmul.f32 %v3435_v63, %v2052_v36 }
0x177f   :  { %v2322_v0 = vpop.permute.xlu0 %2321 }
0x1780   :  { %v2324_v1 = vmul.f32 %v3435_v63, %v2322_v0 }
0x1782   :  { %2326 = vrot.lane.b32.xlu1 %v2324_v1, %s3466_s29 }
0x17f4   :  { %v2327_v6 = vpop.permute.xlu1 %2326 }
0x17f5   :  { %v2329_v7 = vadd.f32 %v2327_v6, %v2319_v5 }
0x17f7   :  { %3436 = vtanh.f32 %v2329_v7 }
0x1801   :  { %v3437_v4 = vpop.eup %3436 }
0x1802   :  { %2332 = vrot.lane.b32.xlu0 %v3437_v4, %s3465_s28 }
0x1874   :  { %v2333_v20 = vpop.permute.xlu0 %2332 }
0x1875   :  { %v2335_v41 = vmul.f32 %v3435_v63, %v2333_v20 }
0x1877   :  { %2364 = vrot.lane.b32.xlu1 %v2335_v41, %s3466_s29 }
0x18e9   :  { %v2365_v21 = vpop.permute.xlu1 %2364 }
0x18ea   :  { %3090 = vmatmul.mubr.msk.f32.vlgmr.msra.gmra.mrb[24].mxu1 %vm136_vm2, %v2365_v21 }
0x18eb   :  { %3127 = vmatprep.mubr.msk.f32.mxu1 %vm3463_vm1, %v3464_v10  ;;  %v2352_v10 = vld [vmem:[%s3986_s2 + $0x80] sm:$0xff]  ;;  %3294 = vmatpush3.bf16.msra.mxu1 %v3293_v27 }
0x18ec   :  { %v3296_v29 = vpack.c.bf16 %v2353_v28, %v2352_v10  ;;  %3295 = vmatprep.subr.bf16.mxu1 %v3462_v3 }
0x18ef   :  { %3297 = vmatpush3.bf16.msra.mxu1 %v3296_v29 }
0x18f0   :  { %3298 = vmatprep.subr.bf16.mxu1 %v3462_v3 }
0x18f3   :  { %3300 = vmatpush3.bf16.msra.mxu1 %v3299_v33 }
0x18f4   :  { %3301 = vmatprep.subr.bf16.mxu1 %v3462_v3  ;;  %v2657_v3 = vld [vmem:[%s3986_s2 + $0x68] ss:$0 sm:$0xff] }
0x18f7   :  { %3303 = vmatpush3.bf16.msra.mxu1 %v3302_v44 }
0x19bd   :  { %v2434_v35 = vpop.f32.mrb[24].mxu1 }
0x19be   :  { %v2435_v36 = vadd.f32 %v2655_v34, %v2434_v35  ;;  %v3091_v37 = vpop.f32.mrb[25].mxu1 }
0x19c0   :  { %v2438_v42 = vmax.f32 %v2435_v36, 0.0 }
0x19c2   :  { %3109 = vmatmul.mubr.msk.f32.vlgmr.msra.gmra.mrb[28].mxu0 %vm2443_vm3, %v2438_v42 }
0x1a95   :  { %v2513_v47 = vpop.f32.mrb[28].mxu0 }
0x1a96   :  { %v2514_v48 = vadd.f32 %v2657_v3, %v2513_v47  ;;  %v3110_v49 = vpop.f32.mrb[29].mxu0 }
0x1a98   :  { %v2517_v12 = vmax.f32 %v2514_v48, 0.0 }
0x1a9a   :  { %3128 = vmatmul.mubr.msk.f32.vlgmr.msra.gmra.mrb[26].mxu1 %vm2443_vm3, %v2517_v12 }
0x1b6d   :  { %v2591_v51 = vpop.f32.mrb[26].mxu1 }
0x1b6e   :  { %v2592_v52 = vadd.f32 %v2659_v45, %v2591_v51  ;;  %v3129_v53 = vpop.f32.mrb[27].mxu1 }
0x1b70   :  { %2596 = vst.msk [vmem:[#allocation2] sm:$0xf] %vm2595_vm4, %v2592_v52 }
0x1b71   :  { %3449 = shalt.err (!%p3446_p4)
}
0x1b72   :  { %s3450_s19 = scalar_lea.hbm %s3987_s3, 64 }
0x1b73   :  { %p3451_p5 = scmp.ne.s32.totalorder %s3987_s3, %s3450_s19  ;;  %p3454_p6 = scmp.lt.u32.totalorder %s3450_s19, %s3987_s3 }
0x1b75   :  { %p3456_p7 = pnand %p3454_p6, %p3451_p5 }
0x1b77   :  { %3459 = shalt.err (!%p3456_p7)
}
0x1b78   :  { %2606 = dma.vmem_to_hbm [thread:$0]  %s2604_s15, 64, %s3987_s3, [#allocation3]  }
0x1b79   :  { %3460 = dma.done.wait [#allocation3], 64  }
0x1b7a   :  { %3461 = vsyncadd [#allocation3], 4294967232 }
0x1b7b   :  { %2610 = vsyncpa [#allocation3], 1 }

</bundles_post_ra>
